<compile_context>
chip_gen: v6e
topology: v6e:2x2x1
jax: 0.10.0
libtpu: 0.0.40
codegen_flags: <defaults>
</compile_context>

<pallas_src>
import math
from functools import partial

import jax
import jax.numpy as jnp
import numpy as np
from jax.experimental import pallas as pl
from jax.experimental.pallas import tpu as pltpu


def _ru8(n):
    return ((n + 7) // 8) * 8


def _elu(x):
    return jnp.where(x > 0, x, jnp.exp(jnp.minimum(x, 0.0)) - 1.0)


# ---------------------------------------------------------------------------
# Fused kernel: one grid step processes Bb items laid out as (Bb*Cp, S) rows.
# ---------------------------------------------------------------------------
def _fused_kernel(cfg, x_ref, bslab_ref, fslab_ref, out_ref):
    f32 = jnp.float32
    bf16 = jnp.bfloat16
    Bb, Cp, S, Hp, L, D = (cfg['Bb'], cfg['Cp'], cfg['S'], cfg['Hp'],
                           cfg['L'], cfg['D'])
    fo = cfg['foff']
    boff = cfg['boff']
    RA, RB = cfg['RA'], cfg['RB']
    BL = Bb * L

    x = x_ref[0]                                               # (Bb*Cp, S) bf16

    # --- SpatialNet: spatial_conv ('same') as a Toeplitz matmul + ELU -------
    t_spa = bslab_ref[boff['tspa']:boff['tspa'] + S, 0:S]      # (S, S) bf16
    b_spa = fslab_ref[fo['misc']:fo['misc'] + 1, 0:1]
    s1 = jnp.dot(x, t_spa, preferred_element_type=f32) + b_spa
    s1 = _elu(s1)

    # MaxPool2d((1, S)): per-row max over the sample lanes
    mvec = jnp.max(s1, axis=1, keepdims=True)                  # (Bb*Cp, 1)

    # spatial_fc (C->8), ELU, spatial_out (8->C): block-diagonal over items
    w1 = fslab_ref[fo['w1']:fo['w1'] + Bb * 8, 0:Bb * Cp]
    b1 = fslab_ref[fo['b1']:fo['b1'] + Bb * 8, 0:1]
    h = _elu(jnp.dot(w1, mvec, preferred_element_type=f32) + b1)
    w2 = fslab_ref[fo['w2']:fo['w2'] + Bb * Cp, 0:Bb * 8]
    b2 = fslab_ref[fo['b2']:fo['b2'] + Bb * Cp, 0:1]
    spa = jnp.dot(w2, h, preferred_element_type=f32) + b2      # (Bb*Cp, 1)

    masked = (x.astype(f32) * spa).astype(bf16)                # (Bb*Cp, S)

    # --- out_conv Conv2d(1,1,(10,C)) valid -----------------------------------
    # stage 1: the 10 shifted row-windows via ONE 0/1 selection matmul (exact)
    nsh = 10 * Bb * Hp
    shift = bslab_ref[boff['shift']:boff['shift'] + nsh, 0:Bb * Cp]
    stacked = jnp.dot(shift, masked, preferred_element_type=f32).astype(bf16)
    # stage 2: per-kernel-row Toeplitz matmuls (128 lanes), f32 accumulation
    conv = jnp.zeros((Bb * Hp, 128), f32)
    for i in range(10):
        t_i = bslab_ref[i * S:(i + 1) * S, :]                  # (S, 128) bf16
        blk = stacked[i * Bb * Hp:(i + 1) * Bb * Hp, :]        # (Bb*Hp, S) bf16
        conv = conv + jnp.dot(blk, t_i, preferred_element_type=f32)

    # --- MaxPool2d(4): rows via one-hot selection matmuls, then lanes -------
    m4 = None
    for r in range(4):
        key = 'rsel%d' % r
        rs = fslab_ref[fo[key]:fo[key] + BL, 0:Bb * Hp]        # (BL, Bb*Hp)
        c = jnp.dot(rs, conv, preferred_element_type=f32)      # (BL, 128)
        m4 = c if m4 is None else jnp.maximum(m4, c)
    b_outc = fslab_ref[fo['misc']:fo['misc'] + 1, 1:2]
    hpool = jnp.tanh(m4 + b_outc)          # tanh / +bias commute with max

    feat = None
    for r in range(4):
        key = 'ssel%d' % r
        ss = fslab_ref[fo[key]:fo[key] + 128, :]               # (128, 128)
        c = jnp.dot(hpool, ss, preferred_element_type=f32)     # (BL, 128)
        feat = c if feat is None else jnp.maximum(feat, c)     # lanes >= D are 0

    # --- single-head attention (block-diagonal softmax over the batch) ------
    wq = fslab_ref[fo['wq']:fo['wq'] + 128, :]
    wk = fslab_ref[fo['wk']:fo['wk'] + 128, :]
    wv = fslab_ref[fo['wv']:fo['wv'] + 128, :]
    wo = fslab_ref[fo['wo']:fo['wo'] + 128, :]
    bq = fslab_ref[fo['batt']:fo['batt'] + 1, :]
    bk = fslab_ref[fo['batt'] + 1:fo['batt'] + 2, :]
    bv = fslab_ref[fo['batt'] + 2:fo['batt'] + 3, :]
    b_o = fslab_ref[fo['batt'] + 3:fo['batt'] + 4, :]

    q = jnp.dot(feat, wq, preferred_element_type=f32) + bq
    k = jnp.dot(feat, wk, preferred_element_type=f32) + bk
    v = jnp.dot(feat, wv, preferred_element_type=f32) + bv
    scores = jax.lax.dot_general(q, k, (((1,), (1,)), ((), ())),
                                 preferred_element_type=f32)   # (BL, BL)
    abias = fslab_ref[fo['abias']:fo['abias'] + BL, 0:BL]
    scores = scores * (1.0 / math.sqrt(D)) + abias
    m = jnp.max(scores, axis=-1, keepdims=True)
    e = jnp.exp(scores - m)
    p = e / jnp.sum(e, axis=-1, keepdims=True)                 # (BL, BL)

    o = jnp.dot(p, v, preferred_element_type=f32)
    o = jnp.dot(o, wo, preferred_element_type=f32) + b_o       # (BL, 128)

    # --- fc(flatten): per-row weighted sum + per-item group sum -------------
    wfc = fslab_ref[fo['wfc']:fo['wfc'] + BL, :]
    gsum = fslab_ref[fo['gsum']:fo['gsum'] + Bb, 0:BL]
    u = jnp.dot(gsum, o * wfc, preferred_element_type=f32)     # (Bb, 128)
    bfc = fslab_ref[fo['misc']:fo['misc'] + 1, 2:3]
    out_col = jnp.sum(u, axis=1, keepdims=True) + bfc          # (Bb, 1)

    # --- packed output slab (single stream, no per-item loops) --------------
    out_ref[0, 0:BL, 0:BL] = p
    out_ref[0, RA:RA + Bb * Cp, 0:1] = spa
    out_ref[0, RB:RB + Bb, 0:1] = out_col


# ---------------------------------------------------------------------------
# Parameter init (deterministic, PyTorch-default-like uniform fan-in init)
# ---------------------------------------------------------------------------
def init_params(key, C, S):
    ks = jax.random.split(key, 20)

    def unif(k, shape, fan_in):
        b = 1.0 / math.sqrt(fan_in)
        return jax.random.uniform(k, shape, jnp.float32, -b, b)

    H_out = C - 10 + 1
    W_out = S - C + 1
    L, D = H_out // 4, W_out // 4

    p = {}
    p['w_spa'] = unif(ks[0], (1, 1, 1, C), C)          # Conv2d(1,1,(1,C))
    p['b_spa'] = unif(ks[1], (), C)
    p['w1'] = unif(ks[2], (8, C), C)                   # Linear(C, 8)
    p['b1'] = unif(ks[3], (8,), C)
    p['w2'] = unif(ks[4], (C, 8), 8)                   # Linear(8, C)
    p['b2'] = unif(ks[5], (C,), 8)
    p['w_out'] = unif(ks[6], (1, 1, 10, C), 10 * C)    # Conv2d(1,1,(10,C))
    p['b_out'] = unif(ks[7], (), 10 * C)
    p['wq'] = unif(ks[8], (D, D), D);  p['bq'] = unif(ks[9], (D,), D)
    p['wk'] = unif(ks[10], (D, D), D); p['bk'] = unif(ks[11], (D,), D)
    p['wv'] = unif(ks[12], (D, D), D); p['bv'] = unif(ks[13], (D,), D)
    p['wo'] = unif(ks[14], (D, D), D); p['bo'] = unif(ks[15], (D,), D)
    p['wfc'] = unif(ks[16], (1, L * D), L * D)         # Linear(L*D, 1)
    p['bfc'] = unif(ks[17], (1,), L * D)
    return p


# ---------------------------------------------------------------------------
# Wrapper: parameter re-layout into two constant slabs + one fused pallas_call
# ---------------------------------------------------------------------------
def complete_net_forward(x, params):
    B, _, C, S = x.shape
    H_out = C - 10 + 1
    W_out = S - C + 1
    L, D = H_out // 4, W_out // 4
    Cp = _ru8(C)
    Hp = _ru8(4 * L)
    f32, bf16 = jnp.float32, jnp.bfloat16

    assert S % 8 == 0 and S <= 128 and W_out <= 128 and D <= 128 and C >= 10

    # batch folding: up to 4 items per step (keeps block-diag structures small)
    max_bb = max(1, min(4, 128 // Cp, 128 // Hp))
    Bb = 1
    for cand in range(max_bb, 1, -1):
        if B % cand == 0:
            Bb = cand
            break
    G = B // Bb
    BL = Bb * L
    H_use = 4 * L

    # ---- streamed input: per-item channel blocks padded to Cp rows, bf16 ---
    xr = x[:, 0, :, :].reshape(G, Bb, C, S)
    xs = jnp.pad(xr, ((0, 0), (0, 0), (0, Cp - C), (0, 0)))
    xs = xs.reshape(G, Bb * Cp, S).astype(bf16)

    # ---- bf16 constant slab --------------------------------------------------
    # [0 : 10*S]        : per-kernel-row Toeplitz blocks T_i (S, 128)
    # [10*S : 11*S]     : spatial 'same' Toeplitz (S, S) in lanes [0:S]
    # [11*S : ...]      : 0/1 shift-stack (10*Bb*Hp, Bb*Cp) in lanes [0:Bb*Cp]
    Kout = params['w_out'][0, 0]                       # (10, C)
    s_idx = np.arange(S)[:, None]
    w_idx = np.arange(128)[None, :]
    jj = s_idx - w_idx
    valid = (jj >= 0) & (jj < C) & (w_idx < W_out)
    jjc = np.clip(jj, 0, C - 1)
    t_blocks = [jnp.where(jnp.asarray(valid), Kout[i][jjc], 0.0)
                for i in range(10)]
    t_stack = jnp.concatenate(t_blocks, axis=0)        # (10*S, 128)

    kvec = params['w_spa'][0, 0, 0, :]                 # (C,)
    left = (C - 1) // 2                                # PyTorch 'same' left pad
    kk = np.arange(S)[:, None] - np.arange(S)[None, :] + left
    vmask = (kk >= 0) & (kk < C)
    t_spa = jnp.where(jnp.asarray(vmask), kvec[np.clip(kk, 0, C - 1)], 0.0)
    t_spa = jnp.pad(t_spa, ((0, 0), (0, 128 - S)))     # (S, 128)

    nsh = 10 * Bb * Hp
    shift_np = np.zeros((nsh, Bb * Cp), np.float32)
    for i in range(10):
        for b in range(Bb):
            for hh in range(H_use):
                shift_np[i * Bb * Hp + b * Hp + hh, b * Cp + hh + i] = 1.0
    shift = jnp.pad(jnp.asarray(shift_np), ((0, 0), (0, 128 - Bb * Cp)))

    bslab = jnp.concatenate([t_stack, t_spa, shift], axis=0).astype(bf16)
    boff = {'tspa': 10 * S, 'shift': 11 * S}

    # ---- f32 constant slab (128-lane, 8-row-aligned sections) ---------------
    sections, foff = [], {}

    def fadd(name, arr):
        arr = jnp.asarray(arr, f32)
        r, c = arr.shape
        foff[name] = sum(int(s.shape[0]) for s in sections)
        sections.append(jnp.pad(arr, ((0, _ru8(r) - r), (0, 128 - c))))

    fadd('misc', jnp.stack([params['b_spa'], params['b_out'],
                            params['bfc'][0]]).reshape(1, 3))

    eyeb = jnp.eye(Bb, dtype=f32)
    W1p = jnp.pad(params['w1'], ((0, 0), (0, Cp - C)))           # (8, Cp)
    fadd('w1', jnp.kron(eyeb, W1p))                              # (Bb*8, Bb*Cp)
    fadd('b1', jnp.tile(params['b1'].reshape(8, 1), (Bb, 1)))
    W2p = jnp.pad(params['w2'], ((0, Cp - C), (0, 0)))           # (Cp, 8)
    fadd('w2', jnp.kron(eyeb, W2p))                              # (Bb*Cp, Bb*8)
    fadd('b2', jnp.tile(jnp.pad(params['b2'], (0, Cp - C)).reshape(Cp, 1),
                        (Bb, 1)))

    for r in range(4):                                           # row maxpool
        rs = np.zeros((BL, Bb * Hp), np.float32)
        for b in range(Bb):
            for l in range(L):
                rs[b * L + l, b * Hp + 4 * l + r] = 1.0
        fadd('rsel%d' % r, rs)

    for r in range(4):                                           # lane maxpool
        ss = np.zeros((128, 128), np.float32)
        for d in range(D):
            ss[4 * d + r, d] = 1.0
        fadd('ssel%d' % r, ss)

    def pad_sq(w):                                               # (D,D)->(128,128)
        return jnp.pad(w.T, ((0, 128 - D), (0, 128 - D)))

    fadd('wq', pad_sq(params['wq']))
    fadd('wk', pad_sq(params['wk']))
    fadd('wv', pad_sq(params['wv']))
    fadd('wo', pad_sq(params['wo']))
    batt = jnp.stack([jnp.pad(params['bq'], (0, 128 - D)),
                      jnp.pad(params['bk'], (0, 128 - D)),
                      jnp.pad(params['bv'], (0, 128 - D)),
                      jnp.pad(params['bo'], (0, 128 - D))], axis=0)
    fadd('batt', batt)

    ids = np.arange(BL) // L
    fadd('abias', np.where(ids[:, None] == ids[None, :], 0.0, -1e9)
         .astype(np.float32))
    fadd('wfc', jnp.tile(params['wfc'].reshape(L, D), (Bb, 1)))  # (BL, D)
    fadd('gsum', np.kron(np.eye(Bb, dtype=np.float32),
                         np.ones((1, L), np.float32)))           # (Bb, BL)

    fslab = jnp.concatenate(sections, axis=0)

    # ---- packed output slab geometry ----------------------------------------
    RA = _ru8(BL)
    RB = RA + Bb * Cp
    R_slab = RB + _ru8(Bb)

    cfg = dict(Bb=Bb, Cp=Cp, S=S, Hp=Hp, L=L, D=D,
               foff=foff, boff=boff, RA=RA, RB=RB)

    slab = pl.pallas_call(
        partial(_fused_kernel, cfg),
        grid=(G,),
        in_specs=[
            pl.BlockSpec((1, Bb * Cp, S), lambda g: (g, 0, 0)),
            pl.BlockSpec(bslab.shape, lambda g: (0, 0)),
            pl.BlockSpec(fslab.shape, lambda g: (0, 0)),
        ],
        out_specs=pl.BlockSpec((1, R_slab, 128), lambda g: (g, 0, 0)),
        out_shape=jax.ShapeDtypeStruct((G, R_slab, 128), f32),
        compiler_params=pltpu.CompilerParams(
            dimension_semantics=("parallel",)),
    )(xs, bslab, fslab)

    # ---- unpack the slab (plain XLA glue) ------------------------------------
    p_all = slab[:, 0:BL, 0:BL].reshape(G, Bb, L, Bb, L)
    idx = jnp.arange(Bb)
    attw = p_all[:, idx, :, idx, :]                    # (Bb, G, L, L)
    attw = jnp.transpose(attw, (1, 0, 2, 3)).reshape(B, L, L)[:, None, :, :]

    spa_rows = slab[:, RA:RB, 0].reshape(G, Bb, Cp)[:, :, :C].reshape(B, C)
    spatial_weights = jnp.broadcast_to(spa_rows[:, None, :, None], (B, 1, C, S))

    output = slab[:, RB:RB + Bb, 0].reshape(B, 1)
    return output, attw, spatial_weights


# ---------------------------------------------------------------------------
# Pure-JAX reference (mirrors the PyTorch forward) for a sanity check
# ---------------------------------------------------------------------------
def reference_forward(x, params):
    B, _, C, S = x.shape
    left = (C - 1) // 2
    right = C - 1 - left
    conv = jax.lax.conv_general_dilated(
        x, params['w_spa'], (1, 1), ((0, 0), (left, right)),
        dimension_numbers=('NCHW', 'OIHW', 'NCHW')) + params['b_spa']
    s1 = jax.nn.elu(conv)
    mvec = jnp.max(s1, axis=3).reshape(B, -1)
    h = jax.nn.elu(mvec @ params['w1'].T + params['b1'])
    spa = h @ params['w2'].T + params['b2']
    spa_b = jnp.broadcast_to(spa[:, None, :, None], (B, 1, C, S))
    masked = x * spa_b
    conv2 = jax.lax.conv_general_dilated(
        masked, params['w_out'], (1, 1), 'VALID',
        dimension_numbers=('NCHW', 'OIHW', 'NCHW')) + params['b_out']
    out_t = jnp.tanh(conv2)
    pooled = jax.lax.reduce_window(out_t, -jnp.inf, jax.lax.max,
                                   (1, 1, 4, 4), (1, 1, 4, 4), 'VALID')
    Hp_, Wp_ = pooled.shape[2], pooled.shape[3]
    feat = pooled.reshape(B, Hp_, Wp_)
    q = feat @ params['wq'].T + params['bq']
    k = feat @ params['wk'].T + params['bk']
    v = feat @ params['wv'].T + params['bv']
    scores = jnp.einsum('bld,bmd->blm', q, k) / math.sqrt(Wp_)
    p = jax.nn.softmax(scores, axis=-1)
    o = jnp.einsum('blm,bmd->bld', p, v)
    o = o @ params['wo'].T + params['bo']
    final = o.reshape(B, -1) @ params['wfc'].T + params['bfc']
    return final, p[:, None, :, :], spa_b


if __name__ == "__main__":
    EEGchannels, EEGsamples, B = 22, 64, 2
    key = jax.random.PRNGKey(0)
    kx, kp = jax.random.split(key)
    x = jax.random.normal(kx, (B, 1, EEGchannels, EEGsamples), jnp.float32)
    params = init_params(kp, EEGchannels, EEGsamples)

    fwd = jax.jit(complete_net_forward)
    out, attw, spaw = fwd(x, params)
    (out, attw, spaw) = jax.block_until_ready((out, attw, spaw))

    ref_out, ref_attw, ref_spaw = reference_forward(x, params)
    np.testing.assert_allclose(np.asarray(out), np.asarray(ref_out),
                               rtol=5e-2, atol=2e-2)
    np.testing.assert_allclose(np.asarray(attw), np.asarray(ref_attw),
                               rtol=5e-2, atol=2e-2)
    np.testing.assert_allclose(np.asarray(spaw), np.asarray(ref_spaw),
                               rtol=5e-2, atol=2e-2)

    # TODO(synk): nn.Dropout exists in the module but is disabled (dropout=False)
    # in CompleteNet.forward, so it is intentionally not implemented.
    print("KERNEL_OK")
</pallas_src>

<mosaic_0001>
module attributes {stable_mosaic.version = 11 : i64} {
  func.func @_fused_kernel(%arg0: i32, %arg1: memref<1x48x64xbf16, #tpu.memory_space<vmem>>, %arg2: memref<1024x128xbf16, #tpu.memory_space<vmem>>, %arg3: memref<1224x128xf32, #tpu.memory_space<vmem>>, %arg4: memref<1x64x128xf32, #tpu.memory_space<vmem>>) attributes {dimension_semantics = [#tpu.dimension_semantics<parallel>], iteration_bounds = array<i64: 1>, scalar_prefetch = 0 : i64, scratch_operands = 0 : i64, tpu.core_type = #tpu.core_type<tc>, window_params = [{transform_indices = @transform_0, window_bounds = array<i64: 1, 48, 64>}, {pipeline_mode = #tpu.pipeline_mode<synchronous>, transform_indices = @transform_1, window_bounds = array<i64: 1024, 128>}, {pipeline_mode = #tpu.pipeline_mode<synchronous>, transform_indices = @transform_2, window_bounds = array<i64: 1224, 128>}, {transform_indices = @transform_3, window_bounds = array<i64: 1, 64, 128>}]} {
    %c0 = arith.constant 0 : index
    %c0_0 = arith.constant 0 : index
    %c0_1 = arith.constant 0 : index
    %0 = vector.load %arg1[%c0, %c0_0, %c0_1] : memref<1x48x64xbf16, #tpu.memory_space<vmem>>, vector<1x48x64xbf16>
    %1 = vector.shape_cast %0 : vector<1x48x64xbf16> to vector<48x64xbf16>
    %c640 = arith.constant 640 : index
    %c0_2 = arith.constant 0 : index
    %2 = vector.load %arg2[%c640, %c0_2] : memref<1024x128xbf16, #tpu.memory_space<vmem>>, vector<64x64xbf16>
    %c0_3 = arith.constant 0 : index
    %c0_4 = arith.constant 0 : index
    %3 = vector.load %arg3[%c0_3, %c0_4] : memref<1224x128xf32, #tpu.memory_space<vmem>>, vector<1x1xf32>
    %cst = arith.constant dense<0.000000e+00> : vector<48x64xf32>
    %4 = tpu.matmul %1, %2, %cst {dimension_numbers = #tpu.dot_dimension_numbers<[1], [0], [0], [1], [0, 0, 1, 1], [], []>} : vector<48x64xbf16>, vector<64x64xbf16>, vector<48x64xf32> -> vector<48x64xf32>
    %5 = vector.broadcast %3 : vector<1x1xf32> to vector<48x64xf32>
    %6 = arith.addf %4, %5 : vector<48x64xf32>
    %cst_5 = arith.constant 0.000000e+00 : f32
    %7 = vector.broadcast %cst_5 : f32 to vector<48x64xf32>
    %8 = arith.cmpf ogt, %6, %7 : vector<48x64xf32>
    %cst_6 = arith.constant 0.000000e+00 : f32
    %9 = vector.broadcast %cst_6 : f32 to vector<48x64xf32>
    %10 = arith.minimumf %6, %9 : vector<48x64xf32>
    %11 = math.exp %10 : vector<48x64xf32>
    %cst_7 = arith.constant 1.000000e+00 : f32
    %12 = vector.broadcast %cst_7 : f32 to vector<48x64xf32>
    %13 = arith.subf %11, %12 : vector<48x64xf32>
    %14 = arith.select %8, %6, %13 : vector<48x64xi1>, vector<48x64xf32>
    %cst_8 = arith.constant dense<0xFF800000> : vector<48xf32>
    %15 = vector.multi_reduction <maximumf>, %14, %cst_8 [1] : vector<48x64xf32> to vector<48xf32>
    %16 = vector.shape_cast %15 : vector<48xf32> to vector<48x1xf32>
    %c8 = arith.constant 8 : index
    %c0_9 = arith.constant 0 : index
    %17 = vector.load %arg3[%c8, %c0_9] : memref<1224x128xf32, #tpu.memory_space<vmem>>, vector<16x48xf32>
    %c24 = arith.constant 24 : index
    %c0_10 = arith.constant 0 : index
    %18 = vector.load %arg3[%c24, %c0_10] : memref<1224x128xf32, #tpu.memory_space<vmem>>, vector<16x1xf32>
    %cst_11 = arith.constant dense<0.000000e+00> : vector<16x1xf32>
    %19 = tpu.matmul %17, %16, %cst_11 {dimension_numbers = #tpu.dot_dimension_numbers<[1], [0], [0], [1], [0, 0, 1, 1], [], []>} : vector<16x48xf32>, vector<48x1xf32>, vector<16x1xf32> -> vector<16x1xf32>
    %20 = arith.addf %19, %18 : vector<16x1xf32>
    %cst_12 = arith.constant 0.000000e+00 : f32
    %21 = vector.broadcast %cst_12 : f32 to vector<16x1xf32>
    %22 = arith.cmpf ogt, %20, %21 : vector<16x1xf32>
    %cst_13 = arith.constant 0.000000e+00 : f32
    %23 = vector.broadcast %cst_13 : f32 to vector<16x1xf32>
    %24 = arith.minimumf %20, %23 : vector<16x1xf32>
    %25 = math.exp %24 : vector<16x1xf32>
    %cst_14 = arith.constant 1.000000e+00 : f32
    %26 = vector.broadcast %cst_14 : f32 to vector<16x1xf32>
    %27 = arith.subf %25, %26 : vector<16x1xf32>
    %28 = arith.select %22, %20, %27 : vector<16x1xi1>, vector<16x1xf32>
    %c40 = arith.constant 40 : index
    %c0_15 = arith.constant 0 : index
    %29 = vector.load %arg3[%c40, %c0_15] : memref<1224x128xf32, #tpu.memory_space<vmem>>, vector<48x16xf32>
    %c88 = arith.constant 88 : index
    %c0_16 = arith.constant 0 : index
    %30 = vector.load %arg3[%c88, %c0_16] : memref<1224x128xf32, #tpu.memory_space<vmem>>, vector<48x1xf32>
    %cst_17 = arith.constant dense<0.000000e+00> : vector<48x1xf32>
    %31 = tpu.matmul %29, %28, %cst_17 {dimension_numbers = #tpu.dot_dimension_numbers<[1], [0], [0], [1], [0, 0, 1, 1], [], []>} : vector<48x16xf32>, vector<16x1xf32>, vector<48x1xf32> -> vector<48x1xf32>
    %32 = arith.addf %31, %30 : vector<48x1xf32>
    %33 = arith.extf %1 : vector<48x64xbf16> to vector<48x64xf32>
    %34 = vector.broadcast %32 : vector<48x1xf32> to vector<48x64xf32>
    %35 = arith.mulf %33, %34 : vector<48x64xf32>
    %36 = arith.truncf %35 : vector<48x64xf32> to vector<48x64xbf16>
    %c704 = arith.constant 704 : index
    %c0_18 = arith.constant 0 : index
    %37 = vector.load %arg2[%c704, %c0_18] : memref<1024x128xbf16, #tpu.memory_space<vmem>>, vector<320x48xbf16>
    %cst_19 = arith.constant dense<0.000000e+00> : vector<320x64xf32>
    %38 = tpu.matmul %37, %36, %cst_19 {dimension_numbers = #tpu.dot_dimension_numbers<[1], [0], [0], [1], [0, 0, 1, 1], [], []>} : vector<320x48xbf16>, vector<48x64xbf16>, vector<320x64xf32> -> vector<320x64xf32>
    %39 = arith.truncf %38 : vector<320x64xf32> to vector<320x64xbf16>
    %cst_20 = arith.constant 0.000000e+00 : f32
    %40 = vector.broadcast %cst_20 : f32 to vector<32x128xf32>
    %c0_21 = arith.constant 0 : index
    %c0_22 = arith.constant 0 : index
    %41 = vector.load %arg2[%c0_21, %c0_22] : memref<1024x128xbf16, #tpu.memory_space<vmem>>, vector<64x128xbf16>
    %42 = vector.extract_strided_slice %39 {offsets = [0, 0], sizes = [32, 64], strides = [1, 1]} : vector<320x64xbf16> to vector<32x64xbf16>
    %cst_23 = arith.constant dense<0.000000e+00> : vector<32x128xf32>
    %43 = tpu.matmul %42, %41, %cst_23 {dimension_numbers = #tpu.dot_dimension_numbers<[1], [0], [0], [1], [0, 0, 1, 1], [], []>} : vector<32x64xbf16>, vector<64x128xbf16>, vector<32x128xf32> -> vector<32x128xf32>
    %44 = arith.addf %40, %43 : vector<32x128xf32>
    %c64 = arith.constant 64 : index
    %c0_24 = arith.constant 0 : index
    %45 = vector.load %arg2[%c64, %c0_24] : memref<1024x128xbf16, #tpu.memory_space<vmem>>, vector<64x128xbf16>
    %46 = vector.extract_strided_slice %39 {offsets = [32, 0], sizes = [32, 64], strides = [1, 1]} : vector<320x64xbf16> to vector<32x64xbf16>
    %cst_25 = arith.constant dense<0.000000e+00> : vector<32x128xf32>
    %47 = tpu.matmul %46, %45, %cst_25 {dimension_numbers = #tpu.dot_dimension_numbers<[1], [0], [0], [1], [0, 0, 1, 1], [], []>} : vector<32x64xbf16>, vector<64x128xbf16>, vector<32x128xf32> -> vector<32x128xf32>
    %48 = arith.addf %44, %47 : vector<32x128xf32>
    %c128 = arith.constant 128 : index
    %c0_26 = arith.constant 0 : index
    %49 = vector.load %arg2[%c128, %c0_26] : memref<1024x128xbf16, #tpu.memory_space<vmem>>, vector<64x128xbf16>
    %50 = vector.extract_strided_slice %39 {offsets = [64, 0], sizes = [32, 64], strides = [1, 1]} : vector<320x64xbf16> to vector<32x64xbf16>
    %cst_27 = arith.constant dense<0.000000e+00> : vector<32x128xf32>
    %51 = tpu.matmul %50, %49, %cst_27 {dimension_numbers = #tpu.dot_dimension_numbers<[1], [0], [0], [1], [0, 0, 1, 1], [], []>} : vector<32x64xbf16>, vector<64x128xbf16>, vector<32x128xf32> -> vector<32x128xf32>
    %52 = arith.addf %48, %51 : vector<32x128xf32>
    %c192 = arith.constant 192 : index
    %c0_28 = arith.constant 0 : index
    %53 = vector.load %arg2[%c192, %c0_28] : memref<1024x128xbf16, #tpu.memory_space<vmem>>, vector<64x128xbf16>
    %54 = vector.extract_strided_slice %39 {offsets = [96, 0], sizes = [32, 64], strides = [1, 1]} : vector<320x64xbf16> to vector<32x64xbf16>
    %cst_29 = arith.constant dense<0.000000e+00> : vector<32x128xf32>
    %55 = tpu.matmul %54, %53, %cst_29 {dimension_numbers = #tpu.dot_dimension_numbers<[1], [0], [0], [1], [0, 0, 1, 1], [], []>} : vector<32x64xbf16>, vector<64x128xbf16>, vector<32x128xf32> -> vector<32x128xf32>
    %56 = arith.addf %52, %55 : vector<32x128xf32>
    %c256 = arith.constant 256 : index
    %c0_30 = arith.constant 0 : index
    %57 = vector.load %arg2[%c256, %c0_30] : memref<1024x128xbf16, #tpu.memory_space<vmem>>, vector<64x128xbf16>
    %58 = vector.extract_strided_slice %39 {offsets = [128, 0], sizes = [32, 64], strides = [1, 1]} : vector<320x64xbf16> to vector<32x64xbf16>
    %cst_31 = arith.constant dense<0.000000e+00> : vector<32x128xf32>
    %59 = tpu.matmul %58, %57, %cst_31 {dimension_numbers = #tpu.dot_dimension_numbers<[1], [0], [0], [1], [0, 0, 1, 1], [], []>} : vector<32x64xbf16>, vector<64x128xbf16>, vector<32x128xf32> -> vector<32x128xf32>
    %60 = arith.addf %56, %59 : vector<32x128xf32>
    %c320 = arith.constant 320 : index
    %c0_32 = arith.constant 0 : index
    %61 = vector.load %arg2[%c320, %c0_32] : memref<1024x128xbf16, #tpu.memory_space<vmem>>, vector<64x128xbf16>
    %62 = vector.extract_strided_slice %39 {offsets = [160, 0], sizes = [32, 64], strides = [1, 1]} : vector<320x64xbf16> to vector<32x64xbf16>
    %cst_33 = arith.constant dense<0.000000e+00> : vector<32x128xf32>
    %63 = tpu.matmul %62, %61, %cst_33 {dimension_numbers = #tpu.dot_dimension_numbers<[1], [0], [0], [1], [0, 0, 1, 1], [], []>} : vector<32x64xbf16>, vector<64x128xbf16>, vector<32x128xf32> -> vector<32x128xf32>
    %64 = arith.addf %60, %63 : vector<32x128xf32>
    %c384 = arith.constant 384 : index
    %c0_34 = arith.constant 0 : index
    %65 = vector.load %arg2[%c384, %c0_34] : memref<1024x128xbf16, #tpu.memory_space<vmem>>, vector<64x128xbf16>
    %66 = vector.extract_strided_slice %39 {offsets = [192, 0], sizes = [32, 64], strides = [1, 1]} : vector<320x64xbf16> to vector<32x64xbf16>
    %cst_35 = arith.constant dense<0.000000e+00> : vector<32x128xf32>
    %67 = tpu.matmul %66, %65, %cst_35 {dimension_numbers = #tpu.dot_dimension_numbers<[1], [0], [0], [1], [0, 0, 1, 1], [], []>} : vector<32x64xbf16>, vector<64x128xbf16>, vector<32x128xf32> -> vector<32x128xf32>
    %68 = arith.addf %64, %67 : vector<32x128xf32>
    %c448 = arith.constant 448 : index
    %c0_36 = arith.constant 0 : index
    %69 = vector.load %arg2[%c448, %c0_36] : memref<1024x128xbf16, #tpu.memory_space<vmem>>, vector<64x128xbf16>
    %70 = vector.extract_strided_slice %39 {offsets = [224, 0], sizes = [32, 64], strides = [1, 1]} : vector<320x64xbf16> to vector<32x64xbf16>
    %cst_37 = arith.constant dense<0.000000e+00> : vector<32x128xf32>
    %71 = tpu.matmul %70, %69, %cst_37 {dimension_numbers = #tpu.dot_dimension_numbers<[1], [0], [0], [1], [0, 0, 1, 1], [], []>} : vector<32x64xbf16>, vector<64x128xbf16>, vector<32x128xf32> -> vector<32x128xf32>
    %72 = arith.addf %68, %71 : vector<32x128xf32>
    %c512 = arith.constant 512 : index
    %c0_38 = arith.constant 0 : index
    %73 = vector.load %arg2[%c512, %c0_38] : memref<1024x128xbf16, #tpu.memory_space<vmem>>, vector<64x128xbf16>
    %74 = vector.extract_strided_slice %39 {offsets = [256, 0], sizes = [32, 64], strides = [1, 1]} : vector<320x64xbf16> to vector<32x64xbf16>
    %cst_39 = arith.constant dense<0.000000e+00> : vector<32x128xf32>
    %75 = tpu.matmul %74, %73, %cst_39 {dimension_numbers = #tpu.dot_dimension_numbers<[1], [0], [0], [1], [0, 0, 1, 1], [], []>} : vector<32x64xbf16>, vector<64x128xbf16>, vector<32x128xf32> -> vector<32x128xf32>
    %76 = arith.addf %72, %75 : vector<32x128xf32>
    %c576 = arith.constant 576 : index
    %c0_40 = arith.constant 0 : index
    %77 = vector.load %arg2[%c576, %c0_40] : memref<1024x128xbf16, #tpu.memory_space<vmem>>, vector<64x128xbf16>
    %78 = vector.extract_strided_slice %39 {offsets = [288, 0], sizes = [32, 64], strides = [1, 1]} : vector<320x64xbf16> to vector<32x64xbf16>
    %cst_41 = arith.constant dense<0.000000e+00> : vector<32x128xf32>
    %79 = tpu.matmul %78, %77, %cst_41 {dimension_numbers = #tpu.dot_dimension_numbers<[1], [0], [0], [1], [0, 0, 1, 1], [], []>} : vector<32x64xbf16>, vector<64x128xbf16>, vector<32x128xf32> -> vector<32x128xf32>
    %80 = arith.addf %76, %79 : vector<32x128xf32>
    %c136 = arith.constant 136 : index
    %c0_42 = arith.constant 0 : index
    %81 = vector.load %arg3[%c136, %c0_42] : memref<1224x128xf32, #tpu.memory_space<vmem>>, vector<6x32xf32>
    %cst_43 = arith.constant dense<0.000000e+00> : vector<6x128xf32>
    %82 = tpu.matmul %81, %80, %cst_43 {dimension_numbers = #tpu.dot_dimension_numbers<[1], [0], [0], [1], [0, 0, 1, 1], [], []>} : vector<6x32xf32>, vector<32x128xf32>, vector<6x128xf32> -> vector<6x128xf32>
    %c144 = arith.constant 144 : index
    %c0_44 = arith.constant 0 : index
    %83 = vector.load %arg3[%c144, %c0_44] : memref<1224x128xf32, #tpu.memory_space<vmem>>, vector<6x32xf32>
    %cst_45 = arith.constant dense<0.000000e+00> : vector<6x128xf32>
    %84 = tpu.matmul %83, %80, %cst_45 {dimension_numbers = #tpu.dot_dimension_numbers<[1], [0], [0], [1], [0, 0, 1, 1], [], []>} : vector<6x32xf32>, vector<32x128xf32>, vector<6x128xf32> -> vector<6x128xf32>
    %85 = arith.maximumf %82, %84 : vector<6x128xf32>
    %c152 = arith.constant 152 : index
    %c0_46 = arith.constant 0 : index
    %86 = vector.load %arg3[%c152, %c0_46] : memref<1224x128xf32, #tpu.memory_space<vmem>>, vector<6x32xf32>
    %cst_47 = arith.constant dense<0.000000e+00> : vector<6x128xf32>
    %87 = tpu.matmul %86, %80, %cst_47 {dimension_numbers = #tpu.dot_dimension_numbers<[1], [0], [0], [1], [0, 0, 1, 1], [], []>} : vector<6x32xf32>, vector<32x128xf32>, vector<6x128xf32> -> vector<6x128xf32>
    %88 = arith.maximumf %85, %87 : vector<6x128xf32>
    %c160 = arith.constant 160 : index
    %c0_48 = arith.constant 0 : index
    %89 = vector.load %arg3[%c160, %c0_48] : memref<1224x128xf32, #tpu.memory_space<vmem>>, vector<6x32xf32>
    %cst_49 = arith.constant dense<0.000000e+00> : vector<6x128xf32>
    %90 = tpu.matmul %89, %80, %cst_49 {dimension_numbers = #tpu.dot_dimension_numbers<[1], [0], [0], [1], [0, 0, 1, 1], [], []>} : vector<6x32xf32>, vector<32x128xf32>, vector<6x128xf32> -> vector<6x128xf32>
    %91 = arith.maximumf %88, %90 : vector<6x128xf32>
    %c0_50 = arith.constant 0 : index
    %c1 = arith.constant 1 : index
    %92 = vector.load %arg3[%c0_50, %c1] : memref<1224x128xf32, #tpu.memory_space<vmem>>, vector<1x1xf32>
    %93 = vector.broadcast %92 : vector<1x1xf32> to vector<6x128xf32>
    %94 = arith.addf %91, %93 : vector<6x128xf32>
    %95 = math.tanh %94 : vector<6x128xf32>
    %c168 = arith.constant 168 : index
    %c0_51 = arith.constant 0 : index
    %96 = vector.load %arg3[%c168, %c0_51] : memref<1224x128xf32, #tpu.memory_space<vmem>>, vector<128x128xf32>
    %cst_52 = arith.constant dense<0.000000e+00> : vector<6x128xf32>
    %97 = tpu.matmul %95, %96, %cst_52 {dimension_numbers = #tpu.dot_dimension_numbers<[1], [0], [0], [1], [0, 0, 1, 1], [], []>} : vector<6x128xf32>, vector<128x128xf32>, vector<6x128xf32> -> vector<6x128xf32>
    %c296 = arith.constant 296 : index
    %c0_53 = arith.constant 0 : index
    %98 = vector.load %arg3[%c296, %c0_53] : memref<1224x128xf32, #tpu.memory_space<vmem>>, vector<128x128xf32>
    %cst_54 = arith.constant dense<0.000000e+00> : vector<6x128xf32>
    %99 = tpu.matmul %95, %98, %cst_54 {dimension_numbers = #tpu.dot_dimension_numbers<[1], [0], [0], [1], [0, 0, 1, 1], [], []>} : vector<6x128xf32>, vector<128x128xf32>, vector<6x128xf32> -> vector<6x128xf32>
    %100 = arith.maximumf %97, %99 : vector<6x128xf32>
    %c424 = arith.constant 424 : index
    %c0_55 = arith.constant 0 : index
    %101 = vector.load %arg3[%c424, %c0_55] : memref<1224x128xf32, #tpu.memory_space<vmem>>, vector<128x128xf32>
    %cst_56 = arith.constant dense<0.000000e+00> : vector<6x128xf32>
    %102 = tpu.matmul %95, %101, %cst_56 {dimension_numbers = #tpu.dot_dimension_numbers<[1], [0], [0], [1], [0, 0, 1, 1], [], []>} : vector<6x128xf32>, vector<128x128xf32>, vector<6x128xf32> -> vector<6x128xf32>
    %103 = arith.maximumf %100, %102 : vector<6x128xf32>
    %c552 = arith.constant 552 : index
    %c0_57 = arith.constant 0 : index
    %104 = vector.load %arg3[%c552, %c0_57] : memref<1224x128xf32, #tpu.memory_space<vmem>>, vector<128x128xf32>
    %cst_58 = arith.constant dense<0.000000e+00> : vector<6x128xf32>
    %105 = tpu.matmul %95, %104, %cst_58 {dimension_numbers = #tpu.dot_dimension_numbers<[1], [0], [0], [1], [0, 0, 1, 1], [], []>} : vector<6x128xf32>, vector<128x128xf32>, vector<6x128xf32> -> vector<6x128xf32>
    %106 = arith.maximumf %103, %105 : vector<6x128xf32>
    %c680 = arith.constant 680 : index
    %c0_59 = arith.constant 0 : index
    %107 = vector.load %arg3[%c680, %c0_59] : memref<1224x128xf32, #tpu.memory_space<vmem>>, vector<128x128xf32>
    %c808 = arith.constant 808 : index
    %c0_60 = arith.constant 0 : index
    %108 = vector.load %arg3[%c808, %c0_60] : memref<1224x128xf32, #tpu.memory_space<vmem>>, vector<128x128xf32>
    %c936 = arith.constant 936 : index
    %c0_61 = arith.constant 0 : index
    %109 = vector.load %arg3[%c936, %c0_61] : memref<1224x128xf32, #tpu.memory_space<vmem>>, vector<128x128xf32>
    %c1064 = arith.constant 1064 : index
    %c0_62 = arith.constant 0 : index
    %110 = vector.load %arg3[%c1064, %c0_62] : memref<1224x128xf32, #tpu.memory_space<vmem>>, vector<128x128xf32>
    %c1192 = arith.constant 1192 : index
    %c0_63 = arith.constant 0 : index
    %111 = vector.load %arg3[%c1192, %c0_63] : memref<1224x128xf32, #tpu.memory_space<vmem>>, vector<1x128xf32>
    %c1193 = arith.constant 1193 : index
    %c0_64 = arith.constant 0 : index
    %112 = vector.load %arg3[%c1193, %c0_64] : memref<1224x128xf32, #tpu.memory_space<vmem>>, vector<1x128xf32>
    %c1194 = arith.constant 1194 : index
    %c0_65 = arith.constant 0 : index
    %113 = vector.load %arg3[%c1194, %c0_65] : memref<1224x128xf32, #tpu.memory_space<vmem>>, vector<1x128xf32>
    %c1195 = arith.constant 1195 : index
    %c0_66 = arith.constant 0 : index
    %114 = vector.load %arg3[%c1195, %c0_66] : memref<1224x128xf32, #tpu.memory_space<vmem>>, vector<1x128xf32>
    %cst_67 = arith.constant dense<0.000000e+00> : vector<6x128xf32>
    %115 = tpu.matmul %106, %107, %cst_67 {dimension_numbers = #tpu.dot_dimension_numbers<[1], [0], [0], [1], [0, 0, 1, 1], [], []>} : vector<6x128xf32>, vector<128x128xf32>, vector<6x128xf32> -> vector<6x128xf32>
    %116 = vector.broadcast %111 : vector<1x128xf32> to vector<6x128xf32>
    %117 = arith.addf %115, %116 : vector<6x128xf32>
    %cst_68 = arith.constant dense<0.000000e+00> : vector<6x128xf32>
    %118 = tpu.matmul %106, %108, %cst_68 {dimension_numbers = #tpu.dot_dimension_numbers<[1], [0], [0], [1], [0, 0, 1, 1], [], []>} : vector<6x128xf32>, vector<128x128xf32>, vector<6x128xf32> -> vector<6x128xf32>
    %119 = vector.broadcast %112 : vector<1x128xf32> to vector<6x128xf32>
    %120 = arith.addf %118, %119 : vector<6x128xf32>
    %cst_69 = arith.constant dense<0.000000e+00> : vector<6x128xf32>
    %121 = tpu.matmul %106, %109, %cst_69 {dimension_numbers = #tpu.dot_dimension_numbers<[1], [0], [0], [1], [0, 0, 1, 1], [], []>} : vector<6x128xf32>, vector<128x128xf32>, vector<6x128xf32> -> vector<6x128xf32>
    %122 = vector.broadcast %113 : vector<1x128xf32> to vector<6x128xf32>
    %123 = arith.addf %121, %122 : vector<6x128xf32>
    %cst_70 = arith.constant dense<0.000000e+00> : vector<6x6xf32>
    %124 = tpu.matmul %117, %120, %cst_70 {dimension_numbers = #tpu.dot_dimension_numbers<[1], [1], [0], [0], [0, 0, 1, 0], [], []>} : vector<6x128xf32>, vector<6x128xf32>, vector<6x6xf32> -> vector<6x6xf32>
    %c1200 = arith.constant 1200 : index
    %c0_71 = arith.constant 0 : index
    %125 = vector.load %arg3[%c1200, %c0_71] : memref<1224x128xf32, #tpu.memory_space<vmem>>, vector<6x6xf32>
    %cst_72 = arith.constant 0.316227764 : f32
    %126 = vector.broadcast %cst_72 : f32 to vector<6x6xf32>
    %127 = arith.mulf %124, %126 : vector<6x6xf32>
    %128 = arith.addf %127, %125 : vector<6x6xf32>
    %cst_73 = arith.constant dense<0xFF800000> : vector<6xf32>
    %129 = vector.multi_reduction <maximumf>, %128, %cst_73 [1] : vector<6x6xf32> to vector<6xf32>
    %130 = vector.shape_cast %129 : vector<6xf32> to vector<6x1xf32>
    %131 = vector.broadcast %130 : vector<6x1xf32> to vector<6x6xf32>
    %132 = arith.subf %128, %131 : vector<6x6xf32>
    %133 = math.exp %132 : vector<6x6xf32>
    %cst_74 = arith.constant dense<0.000000e+00> : vector<6xf32>
    %134 = vector.multi_reduction <add>, %133, %cst_74 [1] : vector<6x6xf32> to vector<6xf32>
    %135 = vector.shape_cast %134 : vector<6xf32> to vector<6x1xf32>
    %136 = vector.broadcast %135 : vector<6x1xf32> to vector<6x6xf32>
    %137 = arith.divf %133, %136 : vector<6x6xf32>
    %cst_75 = arith.constant dense<0.000000e+00> : vector<6x128xf32>
    %138 = tpu.matmul %137, %123, %cst_75 {dimension_numbers = #tpu.dot_dimension_numbers<[1], [0], [0], [1], [0, 0, 1, 1], [], []>} : vector<6x6xf32>, vector<6x128xf32>, vector<6x128xf32> -> vector<6x128xf32>
    %cst_76 = arith.constant dense<0.000000e+00> : vector<6x128xf32>
    %139 = tpu.matmul %138, %110, %cst_76 {dimension_numbers = #tpu.dot_dimension_numbers<[1], [0], [0], [1], [0, 0, 1, 1], [], []>} : vector<6x128xf32>, vector<128x128xf32>, vector<6x128xf32> -> vector<6x128xf32>
    %140 = vector.broadcast %114 : vector<1x128xf32> to vector<6x128xf32>
    %141 = arith.addf %139, %140 : vector<6x128xf32>
    %c1208 = arith.constant 1208 : index
    %c0_77 = arith.constant 0 : index
    %142 = vector.load %arg3[%c1208, %c0_77] : memref<1224x128xf32, #tpu.memory_space<vmem>>, vector<6x128xf32>
    %c1216 = arith.constant 1216 : index
    %c0_78 = arith.constant 0 : index
    %143 = vector.load %arg3[%c1216, %c0_78] : memref<1224x128xf32, #tpu.memory_space<vmem>>, vector<2x6xf32>
    %144 = arith.mulf %141, %142 : vector<6x128xf32>
    %cst_79 = arith.constant dense<0.000000e+00> : vector<2x128xf32>
    %145 = tpu.matmul %143, %144, %cst_79 {dimension_numbers = #tpu.dot_dimension_numbers<[1], [0], [0], [1], [0, 0, 1, 1], [], []>} : vector<2x6xf32>, vector<6x128xf32>, vector<2x128xf32> -> vector<2x128xf32>
    %c0_80 = arith.constant 0 : index
    %c2 = arith.constant 2 : index
    %146 = vector.load %arg3[%c0_80, %c2] : memref<1224x128xf32, #tpu.memory_space<vmem>>, vector<1x1xf32>
    %cst_81 = arith.constant dense<0.000000e+00> : vector<2xf32>
    %147 = vector.multi_reduction <add>, %145, %cst_81 [1] : vector<2x128xf32> to vector<2xf32>
    %148 = vector.shape_cast %147 : vector<2xf32> to vector<2x1xf32>
    %149 = vector.broadcast %146 : vector<1x1xf32> to vector<2x1xf32>
    %150 = arith.addf %148, %149 : vector<2x1xf32>
    %c0_82 = arith.constant 0 : index
    %c0_83 = arith.constant 0 : index
    %c0_84 = arith.constant 0 : index
    %151 = vector.load %arg4[%c0_82, %c0_83, %c0_84] : memref<1x64x128xf32, #tpu.memory_space<vmem>>, vector<1x6x6xf32>
    %152 = vector.shape_cast %151 : vector<1x6x6xf32> to vector<6x6xf32>
    %153 = vector.shape_cast %137 : vector<6x6xf32> to vector<1x6x6xf32>
    tpu.vector_store %arg4[%c0_82, %c0_83, %c0_84], %153 {strides = array<i32>} : memref<1x64x128xf32, #tpu.memory_space<vmem>>, vector<1x6x6xf32>,
    %c0_85 = arith.constant 0 : index
    %c8_86 = arith.constant 8 : index
    %c0_87 = arith.constant 0 : index
    %154 = vector.load %arg4[%c0_85, %c8_86, %c0_87] : memref<1x64x128xf32, #tpu.memory_space<vmem>>, vector<1x48x1xf32>
    %155 = vector.shape_cast %154 : vector<1x48x1xf32> to vector<48x1xf32>
    %156 = vector.shape_cast %32 : vector<48x1xf32> to vector<1x48x1xf32>
    tpu.vector_store %arg4[%c0_85, %c8_86, %c0_87], %156 {strides = array<i32>} : memref<1x64x128xf32, #tpu.memory_space<vmem>>, vector<1x48x1xf32>,
    %c0_88 = arith.constant 0 : index
    %c56 = arith.constant 56 : index
    %c0_89 = arith.constant 0 : index
    %157 = vector.load %arg4[%c0_88, %c56, %c0_89] : memref<1x64x128xf32, #tpu.memory_space<vmem>>, vector<1x2x1xf32>
    %158 = vector.shape_cast %157 : vector<1x2x1xf32> to vector<2x1xf32>
    %159 = vector.shape_cast %150 : vector<2x1xf32> to vector<1x2x1xf32>
    tpu.vector_store %arg4[%c0_88, %c56, %c0_89], %159 {strides = array<i32>} : memref<1x64x128xf32, #tpu.memory_space<vmem>>, vector<1x2x1xf32>,
    return
  }
  func.func @transform_0(%arg0: i32) -> (i32, i32, i32) {
    %c0_i32 = arith.constant 0 : i32
    %c0_i32_0 = arith.constant 0 : i32
    %c0_i32_1 = arith.constant 0 : i32
    return %arg0, %c0_i32, %c0_i32_0 : i32, i32, i32
  }
  func.func @transform_1(%arg0: i32) -> (i32, i32) {
    %c0_i32 = arith.constant 0 : i32
    %c0_i32_0 = arith.constant 0 : i32
    %c0_i32_1 = arith.constant 0 : i32
    return %c0_i32, %c0_i32_0 : i32, i32
  }
  func.func @transform_2(%arg0: i32) -> (i32, i32) {
    %c0_i32 = arith.constant 0 : i32
    %c0_i32_0 = arith.constant 0 : i32
    %c0_i32_1 = arith.constant 0 : i32
    return %c0_i32, %c0_i32_0 : i32, i32
  }
  func.func @transform_3(%arg0: i32) -> (i32, i32, i32) {
    %c0_i32 = arith.constant 0 : i32
    %c0_i32_0 = arith.constant 0 : i32
    %c0_i32_1 = arith.constant 0 : i32
    return %arg0, %c0_i32, %c0_i32_0 : i32, i32, i32
  }
}

</mosaic_0001>

<bundles_post_ra>
// kernel: tile.23
= control target key start
LH: loop header
LB: loop body
LE: loop exit
PB: predicated region body
PF: predicated region fallthrough
CT: control target
= control target key end

     0   :  { %vm12_vm0 = vcmask 80896   ;;  %s43_s0 = inlined_call_operand.vmem [shape: f32[2,3,10], index: 0, kind: input, shape index: {}]   ;;  %s44_s1 = inlined_call_operand.vmem [shape: f32[6,10], index: 1, kind: output, shape index: {}]  }
   0x1   :  { %v19_v0 = vld [vmem:[%s43_s0 + $0x4] sm:$0xf]  ;;  %v9_v1 = vld [vmem:[%s43_s0] sm:$0xf] }
   0x2   :  { %8 = vst [vmem:[#allocation0 + $0x8] sm:$0xf] %v19_v0  ;;  %10 = vst [vmem:[#allocation0] sm:$0xf] %v9_v1 }
   0x9   :  { %v11_v2 = vld [vmem:[#allocation0] sm:$0x7]   ;;  %v15_v3 = vld [vmem:[#allocation0 + $0x8] sm:$0x7]  }
   0xa   :  { %13 = vst.msk [vmem:[%s44_s1] sm:$0x7] %vm12_vm0, %v11_v2   ;;  %20 = vst.msk [vmem:[%s44_s1 + $0x3] sm:$0x7] %vm12_vm0, %v15_v3  }

// kernel: squeeze.28
= control target key start
LH: loop header
LB: loop body
LE: loop exit
PB: predicated region body
PF: predicated region fallthrough
CT: control target
= control target key end

     0   :  { %vm8_vm0 = vcmask 195584   ;;  %s42_s0 = inlined_call_operand.vmem [shape: f32[48], index: 0, kind: input, shape index: {}]   ;;  %s43_s1 = inlined_call_operand.vmem [shape: f32[1,2,24], index: 1, kind: output, shape index: {}]  }
   0x1   :  { %v5_v0 = vld [vmem:[%s42_s0] sm:$0x1]  ;;  %s25_s0 = smov 104  }
   0x2   :  { %6 = vst [vmem:[#allocation1] sm:$0x1] %v5_v0 }
   0x9   :  { %v10_v1 = vld [vmem:[#allocation1] sm:$0x1]  }
   0xa   :  { %v7_v2 = vld [vmem:[#allocation1] sm:$0x1]   ;;  %11 = vrot.lane.b32.xlu0 %v10_v1, %s25_s0 }
   0xb   :  { %9 = vst.msk [vmem:[#allocation0] sm:$0x1] %vm8_vm0, %v7_v2  }
  0x7c   :  { %v12_v3 = vpop.permute.xlu0 %11  }
  0x7d   :  { %15 = vst.msk [vmem:[#allocation0 + $0x1] sm:$0x1] %vm8_vm0, %v12_v3  }
  0x84   :  { %v20_v4 = vld [vmem:[#allocation0] sm:$0x3] }
  0x85   :  { %23 = vst [vmem:[%s43_s1] sm:$0x3] %v20_v4 }

// kernel: complete_net_forward.1
= control target key start
LH: loop header
LB: loop body
LE: loop exit
PB: predicated region body
PF: predicated region fallthrough
CT: control target
= control target key end

     0   :  { %v4130_v0 = vmov 0.0   ;;  %vm4131_vm0 = vmmov 0   ;;  %vm73_vm1 = vcmask 523264   ;;  %vm198_vm8 = vcmask 392192   ;;  %s4133_s27 = smov 127   ;;  %s4134_s21 = smov 126   ;;  %s5173_s1 = inlined_call_operand.vmem [shape: bf16[1024,128], index: 1, kind: input, shape index: {}]   ;;  %s5174_s2 = inlined_call_operand.vmem [shape: f32[1224,128], index: 2, kind: input, shape index: {}]   ;;  %s5175_s0 = inlined_call_operand.vmem [shape: bf16[1,48,64], index: 0, kind: input, shape index: {}]   ;;  %s5176_s3 = inlined_call_operand.vmem [shape: f32[1,64,128], index: 3, kind: output, shape index: {}]  }
   0x1   :  { %3471 = vmatprep.subr.bf16.mxu0 %v4130_v0  ;;  %v4035_v1 = vld [vmem:[%s5173_s1 + $0x158] sm:$0xff]   ;;  %3479 = vmatprep.mubr.msk.bf16.mxu0 %vm4131_vm0, %v4130_v0  ;;  %v4036_v2 = vld [vmem:[%s5173_s1 + $0x150] sm:$0xff]   ;;  %v4037_v3 = vld [vmem:[%s5173_s1 + $0x148] sm:$0xff]   ;;  %vm304_vm9 = vcmask 130048   ;;  %vm3048_vm12 = vcmask 7168   ;;  %vm1779_vm13 = vcmask 261120  }
   0x2   :  { %3472 = vmatpush3.bf16.msra.mxu0 %v4035_v1  ;;  %v29_v4 = vld [vmem:[%s5174_s2] sm:$0x1]  ;;  %v4184_v7 = vld [vmem:[%s5175_s0 + $0x8] sm:$0xff]   ;;  %v4193_v8 = vld [vmem:[%s5175_s0 + $0x10] sm:$0xff]   ;;  %vm2811_vm14 = vcmask 1045504   ;;  %vm2795_vm15 = vcmask 46080  }
   0x3   :  { %3473 = vmatprep.subr.bf16.mxu0 %v4130_v0  ;;  %4024 = vpush %v29_v4  ;;  %v4038_v5 = vld [vmem:[%s5173_s1 + $0x140] sm:$0xff]   ;;  %v194_v1 = vld [vmem:[%s5174_s2 + $0x8] sm:$0xff] }
   0x4   :  { %v4178_v6 = vld [vmem:[%s5175_s0] sm:$0xff]   ;;  %3503 = vmatprep.mubr.msk.f32.mxu1 %vm198_vm8, %v194_v1  ;;  %v421_v1 = vunpack.c.h.bf16 %v4184_v7 }
   0x6   :  { %3474 = vmatpush3.bf16.msra.mxu0 %v4036_v2 }
   0x7   :  { %3475 = vmatprep.subr.bf16.mxu0 %v4130_v0 }
   0xa   :  { %3476 = vmatpush3.bf16.msra.mxu0 %v4037_v3 }
   0xb   :  { %3477 = vmatprep.subr.bf16.mxu0 %v4130_v0 }
   0xe   :  { %3478 = vmatpush3.bf16.msra.mxu0 %v4038_v5 }
  0x11   :  { %3480 = vmatmul.mubr.msk.bf16.vlgmr.msra.gmra.mxu0 %vm73_vm1, %v4178_v6 }
  0x12   :  { %3483 = vmatprep.mubr.msk.bf16.mxu0 %vm4131_vm0, %v4130_v0 }
  0x19   :  { %3484 = vmatmul.mubr.msk.bf16.gmra.mxu0 %vm73_vm1, %v4184_v7 }
  0x1a   :  { %3487 = vmatprep.mubr.msk.bf16.mxu0 %vm4131_vm0, %v4130_v0 }
  0x21   :  { %3488 = vmatmul.mubr.msk.bf16.gmra.mxu0 %vm73_vm1, %v4193_v8 }
  0x34   :  { %s4025_s28 = spop %4024 }
  0x35   :  { %v32_v12 = vstv %s4025_s28 }
  0xd1   :  { %v117_v9 = vpop.f32.mrf.mxu0 }
  0xd2   :  { %v118_v14 = vadd.f32 %v117_v9, %v32_v12 }
  0xd3   :  { %v3481_v10 = vpop.f32.mrf.mxu0 }
  0xd4   :  { %v146_v19 = vmin.f32 %v118_v14, 0.0  ;;  %vm140_vm4 = vcmp.gt.f32.partialorder %v118_v14, 0.0 }
  0xd5   :  { %v120_v11 = vpop.f32.mrf.mxu0 }
  0xd6   :  { %v152_v25 = vmul.f32 1.442695, %v146_v19  ;;  %v121_v27 = vadd.f32 %v120_v11, %v32_v12  ;;  %v195_v11 = vld [vmem:[%s5174_s2 + $0x10] sm:$0xff] }
  0xd7   :  { %v3482_v13 = vpop.f32.mrf.mxu0 }
  0xd8   :  { %v147_v33 = vmin.f32 %v121_v27, 0.0  ;;  %vm141_vm7 = vcmp.gt.f32.partialorder %v121_v27, 0.0  ;;  %v197_v13 = vld [vmem:[%s5174_s2 + $0x20] sm:$0xff] }
  0xd9   :  { %v125_v15 = vpop.f32.mrf.mxu0 }
  0xda   :  { %v126_v16 = vadd.f32 %v125_v15, %v32_v12  ;;  %v154_v38 = vmul.f32 1.442695, %v147_v33  ;;  %v196_v15 = vld [vmem:[%s5174_s2 + $0x18] sm:$0xff]  ;;  %v297_v33 = vld [vmem:[%s5174_s2 + $0x50] sm:$0xff] }
  0xdb   :  { %v3485_v17 = vpop.f32.mrf.mxu0 }
  0xdc   :  { %v148_v18 = vmin.f32 %v126_v16, 0.0  ;;  %vm142_vm3 = vcmp.gt.f32.partialorder %v126_v16, 0.0 }
  0xdd   :  { %v128_v20 = vpop.f32.mrf.mxu0 }
  0xde   :  { %v156_v21 = vmul.f32 1.442695, %v148_v18  ;;  %v129_v22 = vadd.f32 %v128_v20, %v32_v12 }
  0xdf   :  { %v3486_v23 = vpop.f32.mrf.mxu0 }
  0xe0   :  { %v149_v24 = vmin.f32 %v129_v22, 0.0  ;;  %4105 = vpow2.f32 %v156_v21  ;;  %vm143_vm2 = vcmp.gt.f32.partialorder %v129_v22, 0.0 }
  0xe1   :  { %v133_v26 = vpop.f32.mrf.mxu0 }
  0xe2   :  { %v158_v28 = vmul.f32 1.442695, %v149_v24  ;;  %v134_v29 = vadd.f32 %v133_v26, %v32_v12 }
  0xe3   :  { %v3489_v30 = vpop.f32.mrf.mxu0 }
  0xe4   :  { %4107 = vpow2.f32 %v158_v28  ;;  %v150_v31 = vmin.f32 %v134_v29, 0.0  ;;  %vm144_vm6 = vcmp.gt.f32.partialorder %v134_v29, 0.0  ;;  %v294_v30 = vld [vmem:[%s5174_s2 + $0x38] sm:$0xff] }
  0xe5   :  { %v136_v32 = vpop.f32.mrf.mxu0  ;;  %4109 = vpow2.f32 %v152_v25 }
  0xe6   :  { %v160_v34 = vmul.f32 1.442695, %v150_v31  ;;  %v137_v35 = vadd.f32 %v136_v32, %v32_v12  ;;  %v292_v12 = vld [vmem:[%s5174_s2 + $0x28] sm:$0xff]  ;;  %v295_v31 = vld [vmem:[%s5174_s2 + $0x40] sm:$0xff] }
  0xe7   :  { %v3490_v36 = vpop.f32.mrf.mxu0  ;;  %v296_v32 = vld [vmem:[%s5174_s2 + $0x48] sm:$0xff] }
  0xe8   :  { %v151_v37 = vmin.f32 %v137_v35, 0.0  ;;  %4111 = vpow2.f32 %v160_v34  ;;  %vm145_vm5 = vcmp.gt.f32.partialorder %v137_v35, 0.0  ;;  %v4132_v34 = vmov 0  }
  0xe9   :  { %4034 = vset.pattern.permute.xlu1 %v4132_v34  ;;  %4033 = vset.pattern.permute.xlu0 %v4132_v34  ;;  %v4065_v34 = vld [vmem:[%s5173_s1 + $0x28] sm:$0xff]  }
  0xea   :  { %v162_v39 = vmul.f32 1.442695, %v151_v37  ;;  %v298_v37 = vld [vmem:[%s5174_s2 + $0x58] sm:$0xff] }
  0xec   :  { %4113 = vpow2.f32 %v162_v39 }
  0xed   :  { %4115 = vpow2.f32 %v154_v38  ;;  %v4106_v40 = vpop.eup %4105 }
  0xee   :  { %v3077_v43 = vadd.f32 -1.0, %v4106_v40  ;;  %v301_v40 = vld [vmem:[%s5174_s2 + $0x70] sm:$0xff] }
  0xf0   :  { %v172_v47 = vsel %vm142_vm3, %v126_v16, %v3077_v43  ;;  %v300_v43 = vld [vmem:[%s5174_s2 + $0x68] sm:$0xff] }
  0xf1   :  { %v4108_v41 = vpop.eup %4107  ;;  %v182_v51 = vsel %vm73_vm1, %v172_v47, -inf }
  0xf2   :  { %v3078_v42 = vadd.f32 -1.0, %v4108_v41  ;;  %v4110_v44 = vpop.eup %4109 }
  0xf3   :  { %v3075_v48 = vadd.f32 -1.0, %v4110_v44 }
  0xf4   :  { %v173_v45 = vsel %vm143_vm2, %v129_v22, %v3078_v42  ;;  %vm3059_vm2 = vcmask 1024  }
  0xf5   :  { %v185_v46 = vsel %vm73_vm1, %v173_v45, -inf  ;;  %v4112_v49 = vpop.eup %4111  ;;  %v170_v52 = vsel %vm140_vm4, %v118_v14, %v3075_v48 }
  0xf6   :  { %186 = vmax.xlane.f32.xlu1 %v185_v46  ;;  %v3079_v54 = vadd.f32 -1.0, %v4112_v49  ;;  %v176_v57 = vsel %vm73_vm1, %v170_v52, -inf  ;;  %v303_v46 = vld [vmem:[%s5174_s2 + $0x80] sm:$0xff]  ;;  %v302_v49 = vld [vmem:[%s5174_s2 + $0x78] sm:$0xff] }
  0xf8   :  { %v174_v59 = vsel %vm144_vm6, %v134_v29, %v3079_v54  ;;  %v293_v29 = vld [vmem:[%s5174_s2 + $0x30] sm:$0xff]  ;;  %v4062_v54 = vld [vmem:[%s5173_s1 + $0x38] sm:$0xff]  }
  0xf9   :  { %v4114_v50 = vpop.eup %4113  ;;  %v188_v61 = vsel %vm73_vm1, %v174_v59, -inf  ;;  %3565 = vmatprep.subr.bf16.mxu0 %v4062_v54 }
  0xfa   :  { %183 = vmax.xlane.f32.xlu1 %v182_v51  ;;  %v3080_v53 = vadd.f32 -1.0, %v4114_v50  ;;  %v4116_v55 = vpop.eup %4115  ;;  %3566 = vmatpush3.bf16.msra.mxu0 %v4062_v54 }
  0xfb   :  { %v3076_v60 = vadd.f32 -1.0, %v4116_v55  ;;  %v423_v55 = vunpack.c.h.bf16 %v4193_v8 }
  0xfc   :  { %v175_v56 = vsel %vm145_vm5, %v137_v35, %v3080_v53  ;;  %v299_v35 = vld [vmem:[%s5174_s2 + $0x60] sm:$0xff] }
  0xfd   :  { %v191_v58 = vsel %vm73_vm1, %v175_v56, -inf  ;;  %v171_v62 = vsel %vm141_vm7, %v121_v27, %v3076_v60  ;;  %v4042_v53 = vld [vmem:[%s5173_s1 + $0x160] sm:$0xff]   ;;  %v422_v56 = vunpack.c.l.bf16 %v4193_v8  ;;  %v419_v8 = vunpack.c.h.bf16 %v4178_v6 }
  0xfe   :  { %177 = vmax.xlane.f32.xlu1 %v176_v57  ;;  %192 = vmax.xlane.f32.xlu0 %v191_v58  ;;  %v179_v63 = vsel %vm73_vm1, %v171_v62, -inf }
 0x102   :  { %189 = vmax.xlane.f32.xlu0 %v188_v61 }
 0x106   :  { %180 = vmax.xlane.f32.xlu0 %v179_v63  ;;  %v420_v63 = vunpack.c.l.bf16 %v4184_v7  ;;  %v4043_v7 = vld [vmem:[%s5173_s1 + $0x168] sm:$0xff]  }
 0x17f   :  { %v187_v2 = vpop.xlane.xlu1 %186 }
 0x183   :  { %v184_v5 = vpop.xlane.xlu1 %183 }
 0x187   :  { %v193_v3 = vpop.xlane.xlu0 %192  ;;  %v178_v10 = vpop.xlane.xlu1 %177 }
 0x188   :  { %3491 = vmatprep.subr.mxu1 %v193_v3 }
 0x189   :  { %3492 = vmatpush3.msra.mxu1 %v193_v3 }
 0x18b   :  { %v190_v4 = vpop.xlane.xlu0 %189 }
 0x18c   :  { %3493 = vmatprep.subr.mxu1 %v190_v4 }
 0x18d   :  { %3494 = vmatpush3.msra.mxu1 %v190_v4 }
 0x18e   :  { %3495 = vmatprep.subr.mxu1 %v187_v2 }
 0x18f   :  { %3496 = vmatpush3.msra.mxu1 %v187_v2  ;;  %v181_v9 = vpop.xlane.xlu0 %180 }
 0x190   :  { %3497 = vmatprep.subr.mxu1 %v184_v5 }
 0x191   :  { %3498 = vmatpush3.msra.mxu1 %v184_v5 }
 0x192   :  { %3499 = vmatprep.subr.mxu1 %v181_v9 }
 0x193   :  { %3500 = vmatpush3.msra.mxu1 %v181_v9 }
 0x194   :  { %3501 = vmatprep.subr.mxu1 %v178_v10 }
 0x195   :  { %3502 = vmatpush3.msra.mxu1 %v178_v10  ;;  %v418_v10 = vunpack.c.l.bf16 %v4178_v6  ;;  %v4045_v6 = vld [vmem:[%s5173_s1 + $0x178] sm:$0xff]  }
 0x196   :  { %3504 = vmatmul.mubr.msk.f32.vlgmr.msra.gmra.mxu1 %vm198_vm8, %v195_v11 }
 0x197   :  { %3510 = vmatprep.mubr.msk.f32.mxu1 %vm304_vm9, %v292_v12 }
 0x256   :  { %v3505_v14 = vpop.f32.mrf.mxu1 }
 0x257   :  { %v277_v16 = vadd.f32 %v3505_v14, %v197_v13 }
 0x258   :  { %v271_v17 = vpop.f32.mrf.mxu1 }
 0x259   :  { %v283_v18 = vmin.f32 %v277_v16, 0.0  ;;  %v272_v19 = vadd.f32 %v271_v17, %v196_v15  ;;  %vm281_vm10 = vcmp.gt.f32.partialorder %v277_v16, 0.0  ;;  %v4044_v15 = vld [vmem:[%s5173_s1 + $0x170] sm:$0xff]   ;;  %v4047_v17 = vld [vmem:[%s5173_s1 + $0x188] sm:$0xff]  }
 0x25b   :  { %v286_v20 = vmul.f32 1.442695, %v283_v18  ;;  %v282_v21 = vmin.f32 %v272_v19, 0.0  ;;  %vm280_vm11 = vcmp.gt.f32.partialorder %v272_v19, 0.0  ;;  %v4048_v18 = vld [vmem:[%s5173_s1 + $0x190] sm:$0xff]  }
 0x25d   :  { %4117 = vpow2.f32 %v286_v20  ;;  %v284_v22 = vmul.f32 1.442695, %v282_v21  ;;  %v4050_v20 = vld [vmem:[%s5173_s1 + $0x1a0] sm:$0xff]   ;;  %v4051_v21 = vld [vmem:[%s5173_s1 + $0x1a8] sm:$0xff]  }
 0x25f   :  { %4119 = vpow2.f32 %v284_v22  ;;  %v4052_v22 = vld [vmem:[%s5173_s1 + $0x1b0] sm:$0xff]  }
 0x26a   :  { %v4118_v23 = vpop.eup %4117 }
 0x26b   :  { %v3084_v24 = vadd.f32 -1.0, %v4118_v23  ;;  %v4053_v23 = vld [vmem:[%s5173_s1 + $0x1b8] sm:$0xff]  }
 0x26c   :  { %v4120_v25 = vpop.eup %4119 }
 0x26d   :  { %v291_v26 = vsel %vm281_vm10, %v277_v16, %v3084_v24  ;;  %v3083_v27 = vadd.f32 -1.0, %v4120_v25  ;;  %v4046_v16 = vld [vmem:[%s5173_s1 + $0x180] sm:$0xff]   ;;  %v4055_v25 = vld [vmem:[%s5173_s1 + $0x1c8] sm:$0xff]  }
 0x26e   :  { %3506 = vmatprep.subr.mxu1 %v291_v26  ;;  %v4054_v24 = vld [vmem:[%s5173_s1 + $0x1c0] sm:$0xff]  }
 0x26f   :  { %3507 = vmatpush3.msra.mxu1 %v291_v26  ;;  %v290_v28 = vsel %vm280_vm11, %v272_v19, %v3083_v27  ;;  %v4049_v19 = vld [vmem:[%s5173_s1 + $0x198] sm:$0xff]   ;;  %v4056_v26 = vld [vmem:[%s5173_s1 + $0x1d0] sm:$0xff]  }
 0x270   :  { %3508 = vmatprep.subr.mxu1 %v290_v28  ;;  %v4057_v27 = vld [vmem:[%s5173_s1 + $0x1d8] sm:$0xff]  }
 0x271   :  { %3509 = vmatpush3.msra.mxu1 %v290_v28  ;;  %v4058_v28 = vld [vmem:[%s5173_s1 + $0x1e0] sm:$0xff]  }
 0x272   :  { %3511 = vmatmul.mubr.msk.f32.vlgmr.msra.gmra.mxu1 %vm304_vm9, %v293_v29  ;;  %v4059_v29 = vld [vmem:[%s5173_s1 + $0x1e8] sm:$0xff]  }
 0x273   :  { %3513 = vmatprep.mubr.msk.f32.mxu1 %vm304_vm9, %v294_v30  ;;  %v4060_v30 = vld [vmem:[%s5173_s1 + $0x1f0] sm:$0xff]  }
 0x276   :  { %3514 = vmatmul.mubr.msk.f32.gmra.mxu1 %vm304_vm9, %v295_v31  ;;  %v4063_v31 = vld [vmem:[%s5173_s1 + $0x30] sm:$0xff]  }
 0x277   :  { %3516 = vmatprep.mubr.msk.f32.mxu1 %vm304_vm9, %v296_v32  ;;  %v4061_v32 = vld [vmem:[%s5173_s1 + $0x1f8] sm:$0xff]   ;;  %3567 = vmatprep.subr.bf16.mxu0 %v4063_v31 }
 0x278   :  { %3568 = vmatpush3.bf16.msra.mxu0 %v4063_v31  ;;  %v4081_v31 = vld [vmem:[%s5173_s1 + $0x98] sm:$0xff]  }
 0x279   :  { %3569 = vmatprep.subr.bf16.mxu0 %v4065_v34 }
 0x27a   :  { %3517 = vmatmul.mubr.msk.f32.gmra.mxu1 %vm304_vm9, %v297_v33  ;;  %v4064_v33 = vld [vmem:[%s5173_s1 + $0xb8] sm:$0xff]  }
 0x27b   :  { %3525 = vmatprep.mubr.msk.bf16.mxu1 %vm198_vm8, %v4042_v53 }
 0x27c   :  { %3570 = vmatpush3.bf16.msra.mxu0 %v4065_v34 }
 0x332   :  { %v3512_v36 = vpop.f32.mrf.mxu1 }
 0x333   :  { %v395_v38 = vadd.f32 %v3512_v36, %v299_v35  ;;  %v4066_v35 = vld [vmem:[%s5173_s1 + $0x20] sm:$0xff]   ;;  %v4067_v36 = vld [vmem:[%s5173_s1 + $0x18] sm:$0xff]  }
 0x334   :  { %v389_v39 = vpop.f32.mrf.mxu1  ;;  %3571 = vmatprep.subr.bf16.mxu0 %v4066_v35 }
 0x335   :  { %3050 = vst.msk [vmem:[%s5176_s3 + $0x10] sm:$0xff] %vm3048_vm12, %v395_v38  ;;  %v390_v41 = vadd.f32 %v389_v39, %v298_v37  ;;  %3572 = vmatpush3.bf16.msra.mxu0 %v4066_v35  ;;  %v4070_v37 = vld [vmem:[%s5173_s1 + $0xb0] sm:$0xff]   ;;  %v4082_v39 = vld [vmem:[%s5173_s1 + $0xa0] sm:$0xff]  }
 0x336   :  { %v3515_v42 = vpop.f32.mrf.mxu1  ;;  %3577 = vmatprep.subr.bf16.mxu0 %v4067_v36 }
 0x337   :  { %3049 = vst.msk [vmem:[%s5176_s3 + $0x8] sm:$0xff] %vm3048_vm12, %v390_v41  ;;  %v405_v44 = vadd.f32 %v3515_v42, %v301_v40  ;;  %v4403_v40 = vld [vmem:[%s5173_s1 + $0xf8] sm:$0xff]  }
 0x338   :  { %v399_v45 = vpop.f32.mrf.mxu1 }
 0x339   :  { %3052 = vst.msk [vmem:[%s5176_s3 + $0x20] sm:$0xff] %vm3048_vm12, %v405_v44  ;;  %v400_v47 = vadd.f32 %v399_v45, %v300_v43 }
 0x33a   :  { %v3518_v48 = vpop.f32.mrf.mxu1 }
 0x33b   :  { %3051 = vst.msk [vmem:[%s5176_s3 + $0x18] sm:$0xff] %vm3048_vm12, %v400_v47  ;;  %v415_v50 = vadd.f32 %v3518_v48, %v303_v46 }
 0x33c   :  { %v409_v51 = vpop.f32.mrf.mxu1 }
 0x33d   :  { %3054 = vst.msk [vmem:[%s5176_s3 + $0x30] sm:$0xff] %vm3048_vm12, %v415_v50  ;;  %v410_v52 = vadd.f32 %v409_v51, %v302_v49  ;;  %451 = vperm.xlu1 %4034, %v415_v50   ;;  %v4068_v51 = vld [vmem:[%s5173_s1 + $0x10] sm:$0xff]  }
 0x33f   :  { %3053 = vst.msk [vmem:[%s5176_s3 + $0x28] sm:$0xff] %vm3048_vm12, %v410_v52  ;;  %446 = vperm.xlu0 %4033, %v410_v52  }
 0x341   :  { %436 = vperm.xlu1 %4034, %v400_v47  }
 0x345   :  { %441 = vperm.xlu1 %4034, %v405_v44  }
 0x349   :  { %426 = vperm.xlu1 %4034, %v390_v41  }
 0x34d   :  { %431 = vperm.xlu1 %4034, %v395_v38   ;;  %v4076_v38 = vld [vmem:[%s5173_s1 + $0xa8] sm:$0xff]  }
 0x3b8   :  { %v452_v57 = vpop.permute.xlu1 %451 }
 0x3b9   :  { %v459_v59 = vmul.f32 %v452_v57, %v423_v55  ;;  %v4069_v55 = vld [vmem:[%s5173_s1 + $0x8] sm:$0xff]  }
 0x3ba   :  { %v447_v58 = vpop.permute.xlu0 %446 }
 0x3bb   :  { %v458_v60 = vmul.f32 %v447_v58, %v422_v56  ;;  %v4071_v58 = vld [vmem:[%s5173_s1] sm:$0xff]  }
 0x3bc   :  { %v437_v61 = vpop.permute.xlu1 %436 }
 0x3bd   :  { %v462_v62 = vpack.c.bf16 %v459_v59, %v458_v60  ;;  %v456_v3 = vmul.f32 %v437_v61, %v420_v63  ;;  %v4072_v61 = vld [vmem:[%s5173_s1 + $0x58] sm:$0xff]  }
 0x3bf   :  { %3519 = vmatprep.subr.bf16.mxu1 %v462_v62 }
 0x3c0   :  { %3520 = vmatpush3.bf16.msra.mxu1 %v462_v62  ;;  %v442_v2 = vpop.permute.xlu1 %441 }
 0x3c1   :  { %v457_v4 = vmul.f32 %v442_v2, %v421_v1 }
 0x3c3   :  { %v461_v5 = vpack.c.bf16 %v457_v4, %v456_v3  ;;  %v4073_v3 = vld [vmem:[%s5173_s1 + $0x50] sm:$0xff]  }
 0x3c4   :  { %v427_v9 = vpop.permute.xlu1 %426 }
 0x3c5   :  { %3521 = vmatprep.subr.bf16.mxu1 %v461_v5  ;;  %v454_v12 = vmul.f32 %v427_v9, %v418_v10  ;;  %v4074_v9 = vld [vmem:[%s5173_s1 + $0x48] sm:$0xff]  }
 0x3c6   :  { %3522 = vmatpush3.bf16.msra.mxu1 %v461_v5 }
 0x3c8   :  { %v432_v11 = vpop.permute.xlu1 %431 }
 0x3c9   :  { %v455_v13 = vmul.f32 %v432_v11, %v419_v8  ;;  %v4075_v11 = vld [vmem:[%s5173_s1 + $0x40] sm:$0xff]  }
 0x3cb   :  { %v460_v14 = vpack.c.bf16 %v455_v13, %v454_v12 }
 0x3cd   :  { %3523 = vmatprep.subr.bf16.mxu1 %v460_v14 }
 0x3ce   :  { %3524 = vmatpush3.bf16.msra.mxu1 %v460_v14  ;;  %v4077_v14 = vld [vmem:[%s5173_s1 + $0x78] sm:$0xff]  }
 0x3cf   :  { %3625 = vmatprep.subr.bf16.mxu1 %v4064_v33 }
 0x3d1   :  { %3526 = vmatmul.mubr.msk.bf16.vlgmr.msra.gmra.mxu1 %vm198_vm8, %v4043_v7 }
 0x3d2   :  { %3529 = vmatprep.mubr.msk.bf16.mxu1 %vm198_vm8, %v4044_v15  ;;  %3626 = vmatpush3.bf16.msra.mxu1 %v4064_v33  ;;  %v4092_v33 = vld [vmem:[%s5173_s1 + $0x138] sm:$0xff]  }
 0x3d3   :  { %3627 = vmatprep.subr.bf16.mxu1 %v4070_v37 }
 0x3d6   :  { %3628 = vmatpush3.bf16.msra.mxu1 %v4070_v37 }
 0x3d7   :  { %3629 = vmatprep.subr.bf16.mxu1 %v4076_v38 }
 0x3d9   :  { %3530 = vmatmul.mubr.msk.bf16.gmra.mxu1 %vm198_vm8, %v4045_v6 }
 0x3da   :  { %3533 = vmatprep.mubr.msk.bf16.mxu1 %vm198_vm8, %v4046_v16  ;;  %3630 = vmatpush3.bf16.msra.mxu1 %v4076_v38  ;;  %v4083_v38 = vld [vmem:[%s5173_s1 + $0x90] sm:$0xff]  }
 0x3db   :  { %3631 = vmatprep.subr.bf16.mxu1 %v4082_v39 }
 0x3de   :  { %3632 = vmatpush3.bf16.msra.mxu1 %v4082_v39 }
 0x3df   :  { %3649 = vmatprep.subr.bf16.mxu1 %v4403_v40 }
 0x3e1   :  { %3534 = vmatmul.mubr.msk.bf16.gmra.mxu1 %vm198_vm8, %v4047_v17 }
 0x3e2   :  { %3537 = vmatprep.mubr.msk.bf16.mxu1 %vm198_vm8, %v4048_v18 }
 0x3e9   :  { %3538 = vmatmul.mubr.msk.bf16.gmra.mxu1 %vm198_vm8, %v4049_v19  ;;  %v4078_v19 = vld [vmem:[%s5173_s1 + $0x70] sm:$0xff]  }
 0x3ea   :  { %3541 = vmatprep.mubr.msk.bf16.mxu1 %vm198_vm8, %v4050_v20 }
 0x3f1   :  { %3542 = vmatmul.mubr.msk.bf16.gmra.mxu1 %vm198_vm8, %v4051_v21  ;;  %v4086_v21 = vld [vmem:[%s5173_s1 + $0xf0] sm:$0xff]  }
 0x3f2   :  { %3545 = vmatprep.mubr.msk.bf16.mxu1 %vm198_vm8, %v4052_v22 }
 0x3f9   :  { %3546 = vmatmul.mubr.msk.bf16.gmra.mxu1 %vm198_vm8, %v4053_v23  ;;  %v4079_v23 = vld [vmem:[%s5173_s1 + $0x68] sm:$0xff]  }
 0x3fa   :  { %3549 = vmatprep.mubr.msk.bf16.mxu1 %vm198_vm8, %v4054_v24 }
 0x401   :  { %3550 = vmatmul.mubr.msk.bf16.gmra.mxu1 %vm198_vm8, %v4055_v25  ;;  %v4088_v25 = vld [vmem:[%s5173_s1 + $0xe8] sm:$0xff]  }
 0x402   :  { %3553 = vmatprep.mubr.msk.bf16.mxu1 %vm198_vm8, %v4056_v26 }
 0x409   :  { %3554 = vmatmul.mubr.msk.bf16.gmra.mxu1 %vm198_vm8, %v4057_v27  ;;  %v4080_v27 = vld [vmem:[%s5173_s1 + $0x60] sm:$0xff]  }
 0x40a   :  { %3557 = vmatprep.mubr.msk.bf16.mxu1 %vm198_vm8, %v4058_v28 }
 0x411   :  { %3558 = vmatmul.mubr.msk.bf16.gmra.mxu1 %vm198_vm8, %v4059_v29  ;;  %v4090_v29 = vld [vmem:[%s5173_s1 + $0xe0] sm:$0xff]  }
 0x412   :  { %3561 = vmatprep.mubr.msk.bf16.mxu1 %vm198_vm8, %v4060_v30 }
 0x419   :  { %3562 = vmatmul.mubr.msk.bf16.gmra.mxu1 %vm198_vm8, %v4061_v32 }
 0x491   :  { %v3527_v41 = vpop.f32.mrf.mxu1 }
 0x493   :  { %v697_v42 = vpop.f32.mrf.mxu1 }
 0x495   :  { %v3528_v43 = vpop.f32.mrf.mxu1 }
 0x496   :  { %v857_v2 = vpack.c.bf16 %v3528_v43, %v3527_v41  ;;  %v4085_v43 = vld [vmem:[%s5173_s1 + $0x88] sm:$0xff]  }
 0x497   :  { %v700_v44 = vpop.f32.mrf.mxu1 }
 0x498   :  { %v856_v53 = vpack.c.bf16 %v700_v44, %v697_v42  ;;  %v4094_v42 = vld [vmem:[%s5173_s1 + $0x130] sm:$0xff]  }
 0x499   :  { %v3531_v45 = vpop.f32.mrf.mxu1 }
 0x49b   :  { %v713_v46 = vpop.f32.mrf.mxu1 }
 0x49d   :  { %v3532_v47 = vpop.f32.mrf.mxu1 }
 0x49e   :  { %v859_v50 = vpack.c.bf16 %v3532_v47, %v3531_v45  ;;  %v4087_v47 = vld [vmem:[%s5173_s1 + $0x80] sm:$0xff]  }
 0x49f   :  { %v716_v48 = vpop.f32.mrf.mxu1 }
 0x4a0   :  { %v858_v49 = vpack.c.bf16 %v716_v48, %v713_v46  ;;  %v4096_v46 = vld [vmem:[%s5173_s1 + $0x128] sm:$0xff]  }
 0x4a1   :  { %v3535_v52 = vpop.f32.mrf.mxu1 }
 0x4a2   :  { %3573 = vmatprep.mubr.msk.bf16.mxu0 %vm73_vm1, %v858_v49 }
 0x4a3   :  { %3574 = vmatmul.mubr.msk.bf16.vlgmr.msra.gmra.mxu0 %vm73_vm1, %v859_v50  ;;  %v729_v54 = vpop.f32.mrf.mxu1  ;;  %v4098_v50 = vld [vmem:[%s5173_s1 + $0x120] sm:$0xff]  }
 0x4a4   :  { %3578 = vmatpush3.bf16.msra.mxu0 %v4067_v36  ;;  %3585 = vmatprep.mubr.msk.bf16.mxu0 %vm73_vm1, %v856_v53 }
 0x4a5   :  { %3579 = vmatprep.subr.bf16.mxu0 %v4068_v51  ;;  %v3536_v56 = vpop.f32.mrf.mxu1 }
 0x4a6   :  { %v861_v18 = vpack.c.bf16 %v3536_v56, %v3535_v52 }
 0x4a7   :  { %v732_v57 = vpop.f32.mrf.mxu1 }
 0x4a8   :  { %3580 = vmatpush3.bf16.msra.mxu0 %v4068_v51  ;;  %v860_v1 = vpack.c.bf16 %v732_v57, %v729_v54  ;;  %v4089_v51 = vld [vmem:[%s5173_s1 + $0xd8] sm:$0xff]   ;;  %v4091_v57 = vld [vmem:[%s5173_s1 + $0xd0] sm:$0xff]  }
 0x4a9   :  { %3581 = vmatprep.subr.bf16.mxu0 %v4069_v55  ;;  %v4418_v59 = vpop.f32.mrf.mxu1 }
 0x4ab   :  { %v745_v60 = vpop.f32.mrf.mxu1 }
 0x4ac   :  { %3582 = vmatpush3.bf16.msra.mxu0 %v4069_v55 }
 0x4ad   :  { %3583 = vmatprep.subr.bf16.mxu0 %v4071_v58  ;;  %v4423_v62 = vpop.f32.mrf.mxu1 }
 0x4ae   :  { %v863_v37 = vpack.c.bf16 %v4423_v62, %v4418_v59  ;;  %v4093_v59 = vld [vmem:[%s5173_s1 + $0xc8] sm:$0xff]  }
 0x4af   :  { %v748_v63 = vpop.f32.mrf.mxu1 }
 0x4b0   :  { %3584 = vmatpush3.bf16.msra.mxu0 %v4071_v58  ;;  %v862_v16 = vpack.c.bf16 %v748_v63, %v745_v60  ;;  %v4095_v60 = vld [vmem:[%s5173_s1 + $0xc0] sm:$0xff]  }
 0x4b1   :  { %3589 = vmatprep.subr.bf16.mxu0 %v4072_v61  ;;  %v4428_v4 = vpop.f32.mrf.mxu1 }
 0x4b3   :  { %3586 = vmatmul.mubr.msk.bf16.vlgmr.msra.gmra.mxu0 %vm73_vm1, %v857_v2  ;;  %v4431_v5 = vpop.f32.mrf.mxu1  ;;  %v4100_v2 = vld [vmem:[%s5173_s1 + $0x108] sm:$0xff]  }
 0x4b4   :  { %3590 = vmatpush3.bf16.msra.mxu0 %v4072_v61  ;;  %3597 = vmatprep.mubr.msk.bf16.mxu0 %vm73_vm1, %v860_v1  ;;  %v4097_v61 = vld [vmem:[%s5173_s1 + $0x118] sm:$0xff]   ;;  %v4099_v1 = vld [vmem:[%s5173_s1 + $0x110] sm:$0xff]  }
 0x4b5   :  { %3591 = vmatprep.subr.bf16.mxu0 %v4073_v3  ;;  %v4437_v10 = vpop.f32.mrf.mxu1 }
 0x4b6   :  { %v865_v56 = vpack.c.bf16 %v4437_v10, %v4428_v4 }
 0x4b7   :  { %v4439_v8 = vpop.f32.mrf.mxu1 }
 0x4b8   :  { %3592 = vmatpush3.bf16.msra.mxu0 %v4073_v3  ;;  %v864_v35 = vpack.c.bf16 %v4439_v8, %v4431_v5  ;;  %v4101_v3 = vld [vmem:[%s5173_s1 + $0x100] sm:$0xff]  }
 0x4b9   :  { %3593 = vmatprep.subr.bf16.mxu0 %v4074_v9  ;;  %v3547_v12 = vpop.f32.mrf.mxu1  ;;  %v4127_v5 = vld [vmem:[%s5174_s2] sm:$0x1] }
 0x4ba   :  { %2078 = vrot.lane.b32.xlu1 %v4127_v5, %s4133_s27 }
 0x4bb   :  { %v777_v13 = vpop.f32.mrf.mxu1 }
 0x4bc   :  { %3594 = vmatpush3.bf16.msra.mxu0 %v4074_v9 }
 0x4bd   :  { %3595 = vmatprep.subr.bf16.mxu0 %v4075_v11  ;;  %v3548_v7 = vpop.f32.mrf.mxu1 }
 0x4be   :  { %v867_v15 = vpack.c.bf16 %v3548_v7, %v3547_v12 }
 0x4bf   :  { %v780_v6 = vpop.f32.mrf.mxu1 }
 0x4c0   :  { %3596 = vmatpush3.bf16.msra.mxu0 %v4075_v11  ;;  %v866_v17 = vpack.c.bf16 %v780_v6, %v777_v13 }
 0x4c1   :  { %3601 = vmatprep.subr.bf16.mxu0 %v4077_v14  ;;  %v4450_v20 = vpop.f32.mrf.mxu1 }
 0x4c2   :  { %3633 = vmatprep.mubr.msk.bf16.mxu1 %vm73_vm1, %v866_v17 }
 0x4c3   :  { %3598 = vmatmul.mubr.msk.bf16.vlgmr.msra.gmra.mxu0 %vm73_vm1, %v861_v18  ;;  %v4457_v22 = vpop.f32.mrf.mxu1  ;;  %3634 = vmatmul.mubr.msk.bf16.vlgmr.msra.gmra.mxu1 %vm73_vm1, %v867_v15 }
 0x4c4   :  { %3602 = vmatpush3.bf16.msra.mxu0 %v4077_v14  ;;  %3609 = vmatprep.mubr.msk.bf16.mxu0 %vm73_vm1, %v862_v16 }
 0x4c5   :  { %3603 = vmatprep.subr.bf16.mxu0 %v4078_v19  ;;  %3650 = vmatpush3.bf16.msra.mxu1 %v4403_v40  ;;  %v4465_v24 = vpop.f32.mrf.mxu1 }
 0x4c6   :  { %3651 = vmatprep.subr.bf16.mxu1 %v4086_v21  ;;  %v869_v63 = vpack.c.bf16 %v4465_v24, %v4450_v20 }
 0x4c7   :  { %v4470_v26 = vpop.f32.mrf.mxu1 }
 0x4c8   :  { %3604 = vmatpush3.bf16.msra.mxu0 %v4078_v19  ;;  %v868_v54 = vpack.c.bf16 %v4470_v26, %v4457_v22 }
 0x4c9   :  { %3605 = vmatprep.subr.bf16.mxu0 %v4079_v23  ;;  %3652 = vmatpush3.bf16.msra.mxu1 %v4086_v21  ;;  %v3555_v28 = vpop.f32.mrf.mxu1 }
 0x4ca   :  { %3653 = vmatprep.subr.bf16.mxu1 %v4088_v25 }
 0x4cb   :  { %v809_v30 = vpop.f32.mrf.mxu1 }
 0x4cc   :  { %3606 = vmatpush3.bf16.msra.mxu0 %v4079_v23 }
 0x4cd   :  { %3607 = vmatprep.subr.bf16.mxu0 %v4080_v27  ;;  %3654 = vmatpush3.bf16.msra.mxu1 %v4088_v25  ;;  %v3556_v32 = vpop.f32.mrf.mxu1 }
 0x4ce   :  { %3655 = vmatprep.subr.bf16.mxu1 %v4090_v29  ;;  %v871_v39 = vpack.c.bf16 %v3556_v32, %v3555_v28 }
 0x4cf   :  { %v812_v34 = vpop.f32.mrf.mxu1 }
 0x4d0   :  { %3608 = vmatpush3.bf16.msra.mxu0 %v4080_v27  ;;  %v870_v36 = vpack.c.bf16 %v812_v34, %v809_v30 }
 0x4d1   :  { %3613 = vmatprep.subr.bf16.mxu0 %v4081_v31  ;;  %3656 = vmatpush3.bf16.msra.mxu1 %v4090_v29  ;;  %v4491_v40 = vpop.f32.mrf.mxu1 }
 0x4d2   :  { %3657 = vmatprep.mubr.msk.bf16.mxu1 %vm73_vm1, %v870_v36  ;;  %3673 = vmatprep.subr.bf16.mxu1 %v4092_v33 }
 0x4d3   :  { %3610 = vmatmul.mubr.msk.bf16.vlgmr.msra.gmra.mxu0 %vm73_vm1, %v863_v37  ;;  %v825_v41 = vpop.f32.mrf.mxu1 }
 0x4d4   :  { %3614 = vmatpush3.bf16.msra.mxu0 %v4081_v31  ;;  %3621 = vmatprep.mubr.msk.bf16.mxu0 %vm73_vm1, %v864_v35 }
 0x4d5   :  { %3615 = vmatprep.subr.bf16.mxu0 %v4083_v38  ;;  %3658 = vmatmul.mubr.msk.bf16.vlgmr.msra.gmra.mxu1 %vm73_vm1, %v871_v39  ;;  %v3560_v44 = vpop.f32.mrf.mxu1 }
 0x4d6   :  { %3674 = vmatpush3.bf16.msra.mxu1 %v4092_v33  ;;  %v873_v4 = vpack.c.bf16 %v3560_v44, %v4491_v40 }
 0x4d7   :  { %v828_v45 = vpop.f32.mrf.mxu1  ;;  %3675 = vmatprep.subr.bf16.mxu1 %v4094_v42 }
 0x4d8   :  { %3616 = vmatpush3.bf16.msra.mxu0 %v4083_v38  ;;  %v872_v62 = vpack.c.bf16 %v828_v45, %v825_v41 }
 0x4d9   :  { %3617 = vmatprep.subr.bf16.mxu0 %v4085_v43  ;;  %v3563_v48 = vpop.f32.mrf.mxu1 }
 0x4da   :  { %3676 = vmatpush3.bf16.msra.mxu1 %v4094_v42 }
 0x4db   :  { %v841_v49 = vpop.f32.mrf.mxu1  ;;  %3677 = vmatprep.subr.bf16.mxu1 %v4096_v46 }
 0x4dc   :  { %3618 = vmatpush3.bf16.msra.mxu0 %v4085_v43 }
 0x4dd   :  { %3619 = vmatprep.subr.bf16.mxu0 %v4087_v47  ;;  %v3564_v52 = vpop.f32.mrf.mxu1 }
 0x4de   :  { %3678 = vmatpush3.bf16.msra.mxu1 %v4096_v46  ;;  %v875_v58 = vpack.c.bf16 %v3564_v52, %v3563_v48 }
 0x4df   :  { %v844_v53 = vpop.f32.mrf.mxu1  ;;  %3679 = vmatprep.subr.bf16.mxu1 %v4098_v50 }
 0x4e0   :  { %3620 = vmatpush3.bf16.msra.mxu0 %v4087_v47  ;;  %v874_v55 = vpack.c.bf16 %v844_v53, %v841_v49 }
 0x4e1   :  { %3637 = vmatprep.subr.bf16.mxu0 %v4089_v51 }
 0x4e2   :  { %3680 = vmatpush3.bf16.msra.mxu1 %v4098_v50  ;;  %3681 = vmatprep.mubr.msk.bf16.mxu1 %vm73_vm1, %v874_v55 }
 0x4e3   :  { %3622 = vmatmul.mubr.msk.bf16.vlgmr.msra.gmra.mxu0 %vm73_vm1, %v865_v56  ;;  %3696 = vmatprep.subr.mxu1 %v4130_v0 }
 0x4e4   :  { %3638 = vmatpush3.bf16.msra.mxu0 %v4089_v51  ;;  %3645 = vmatprep.mubr.msk.bf16.mxu0 %vm73_vm1, %v868_v54 }
 0x4e5   :  { %3639 = vmatprep.subr.bf16.mxu0 %v4091_v57  ;;  %3682 = vmatmul.mubr.msk.bf16.vlgmr.msra.gmra.mxu1 %vm73_vm1, %v875_v58 }
 0x4e6   :  { %3704 = vmatprep.mubr.msk.f32.mxu1 %vm4131_vm0, %v4130_v0 }
 0x4e8   :  { %3640 = vmatpush3.bf16.msra.mxu0 %v4091_v57 }
 0x4e9   :  { %3641 = vmatprep.subr.bf16.mxu0 %v4093_v59 }
 0x4ec   :  { %3642 = vmatpush3.bf16.msra.mxu0 %v4093_v59 }
 0x4ed   :  { %3643 = vmatprep.subr.bf16.mxu0 %v4095_v60 }
 0x4f0   :  { %3644 = vmatpush3.bf16.msra.mxu0 %v4095_v60 }
 0x4f1   :  { %3661 = vmatprep.subr.bf16.mxu0 %v4097_v61 }
 0x4f3   :  { %3646 = vmatmul.mubr.msk.bf16.vlgmr.msra.gmra.mxu0 %vm73_vm1, %v869_v63 }
 0x4f4   :  { %3662 = vmatpush3.bf16.msra.mxu0 %v4097_v61  ;;  %3669 = vmatprep.mubr.msk.bf16.mxu0 %vm73_vm1, %v872_v62 }
 0x4f5   :  { %3663 = vmatprep.subr.bf16.mxu0 %v4099_v1 }
 0x4f8   :  { %3664 = vmatpush3.bf16.msra.mxu0 %v4099_v1 }
 0x4f9   :  { %3665 = vmatprep.subr.bf16.mxu0 %v4100_v2 }
 0x4fc   :  { %3666 = vmatpush3.bf16.msra.mxu0 %v4100_v2 }
 0x4fd   :  { %3667 = vmatprep.subr.bf16.mxu0 %v4101_v3 }
 0x500   :  { %3668 = vmatpush3.bf16.msra.mxu0 %v4101_v3 }
 0x501   :  { %3685 = vmatprep.subr.mxu0 %v4130_v0 }
 0x503   :  { %3670 = vmatmul.mubr.msk.bf16.vlgmr.msra.gmra.mxu0 %vm73_vm1, %v873_v4  ;;  %vm2807_vm1 = vcmask 48128  }
 0x504   :  { %3693 = vmatprep.mubr.msk.f32.mxu0 %vm4131_vm0, %v4130_v0 }
 0x563   :  { %v3575_v9 = vpop.f32.mrf.mxu0 }
 0x565   :  { %v956_v10 = vpop.f32.mrf.mxu0 }
 0x567   :  { %v3576_v8 = vpop.f32.mrf.mxu0 }
 0x569   :  { %v959_v11 = vpop.f32.mrf.mxu0 }
 0x573   :  { %v3587_v12 = vpop.f32.mrf.mxu0 }
 0x574   :  { %v1044_v32 = vadd.f32 %v3587_v12, %v3575_v9 }
 0x575   :  { %v1035_v13 = vpop.f32.mrf.mxu0 }
 0x576   :  { %v1036_v39 = vadd.f32 %v1035_v13, %v956_v10 }
 0x577   :  { %v3588_v14 = vpop.f32.mrf.mxu0 }
 0x578   :  { %v1047_v33 = vadd.f32 %v3588_v14, %v3576_v8 }
 0x579   :  { %v1038_v7 = vpop.f32.mrf.mxu0 }
 0x57a   :  { %v1039_v35 = vadd.f32 %v1038_v7, %v959_v11 }
 0x583   :  { %v3599_v15 = vpop.f32.mrf.mxu0  ;;  %v3635_v21 = vpop.f32.mrf.mxu1 }
 0x584   :  { %v1139_v36 = vadd.f32 %v3599_v15, %v1044_v32  ;;  %v2096_v32 = vld [vmem:[%s5174_s2 + $0x100] sm:$0xff] }
 0x585   :  { %v1122_v6 = vpop.f32.mrf.mxu0  ;;  %v1395_v24 = vpop.f32.mrf.mxu1 }
 0x586   :  { %v1137_v44 = vadd.f32 %v1122_v6, %v1036_v39  ;;  %v2179_v39 = vld [vmem:[%s5174_s2 + $0x168] sm:$0xff] }
 0x587   :  { %v3600_v16 = vpop.f32.mrf.mxu0  ;;  %v3636_v26 = vpop.f32.mrf.mxu1 }
 0x588   :  { %v1140_v37 = vadd.f32 %v3600_v16, %v1047_v33  ;;  %v2182_v33 = vld [vmem:[%s5174_s2 + $0x180] sm:$0xff] }
 0x589   :  { %v1125_v17 = vpop.f32.mrf.mxu0  ;;  %v1398_v28 = vpop.f32.mrf.mxu1 }
 0x58a   :  { %v1138_v40 = vadd.f32 %v1125_v17, %v1039_v35  ;;  %v2181_v35 = vld [vmem:[%s5174_s2 + $0x178] sm:$0xff] }
 0x593   :  { %v3611_v18 = vpop.f32.mrf.mxu0 }
 0x594   :  { %v1230_v41 = vadd.f32 %v3611_v18, %v1139_v36  ;;  %v2094_v36 = vld [vmem:[%s5174_s2 + $0xf0] sm:$0xff] }
 0x595   :  { %v1213_v19 = vpop.f32.mrf.mxu0  ;;  %v3659_v29 = vpop.f32.mrf.mxu1 }
 0x596   :  { %v1228_v49 = vadd.f32 %v1213_v19, %v1137_v44  ;;  %v1778_v19 = vld [vmem:[%s5174_s2 + $0x88] sm:$0x3f]  ;;  %v2090_v44 = vld [vmem:[%s5174_s2 + $0xd0] sm:$0xff] }
 0x597   :  { %v3612_v20 = vpop.f32.mrf.mxu0  ;;  %v1577_v34 = vpop.f32.mrf.mxu1 }
 0x598   :  { %v1231_v42 = vadd.f32 %v3612_v20, %v1140_v37  ;;  %v2079_v20 = vpop.permute.xlu1 %2078  ;;  %v2180_v37 = vld [vmem:[%s5174_s2 + $0x170] sm:$0xff] }
 0x599   :  { %v1216_v22 = vpop.f32.mrf.mxu0  ;;  %v3660_v43 = vpop.f32.mrf.mxu1  ;;  %4026 = vpush %v2079_v20  ;;  %v2354_v20 = vld [vmem:[%s5174_s2 + $0x270] sm:$0xff] }
 0x59a   :  { %v1229_v45 = vadd.f32 %v1216_v22, %v1138_v40  ;;  %v1928_v22 = vld [vmem:[%s5174_s2 + $0x98] sm:$0x3f]  ;;  %v2092_v40 = vld [vmem:[%s5174_s2 + $0xe0] sm:$0xff] }
 0x59b   :  { %v1580_v51 = vpop.f32.mrf.mxu1 }
 0x5a3   :  { %v3623_v23 = vpop.f32.mrf.mxu0 }
 0x5a4   :  { %v1321_v46 = vadd.f32 %v3623_v23, %v1230_v41  ;;  %v2003_v23 = vld [vmem:[%s5174_s2 + $0xa0] sm:$0x3f] }
 0x5a5   :  { %v1304_v25 = vpop.f32.mrf.mxu0  ;;  %v3683_v55 = vpop.f32.mrf.mxu1  ;;  %v2178_v41 = vld [vmem:[%s5174_s2 + $0x160] sm:$0xff] }
 0x5a6   :  { %v1319_v52 = vadd.f32 %v1304_v25, %v1228_v49  ;;  %v1412_v53 = vadd.f32 %v3635_v21, %v1321_v46  ;;  %v1853_v21 = vld [vmem:[%s5174_s2 + $0x90] sm:$0x3f]  ;;  %v2186_v25 = vld [vmem:[%s5174_s2 + $0x1a0] sm:$0xff]  ;;  %v2089_v46 = vld [vmem:[%s5174_s2 + $0xc8] sm:$0xff] }
 0x5a7   :  { %v3624_v27 = vpop.f32.mrf.mxu0  ;;  %v1759_v63 = vpop.f32.mrf.mxu1  ;;  %v2174_v49 = vld [vmem:[%s5174_s2 + $0x140] sm:$0xff] }
 0x5a8   :  { %v1322_v47 = vadd.f32 %v3624_v27, %v1231_v42  ;;  %v1410_v61 = vadd.f32 %v1395_v24, %v1319_v52  ;;  %v2100_v24 = vld [vmem:[%s5174_s2 + $0x120] sm:$0xff]  ;;  %v2185_v27 = vld [vmem:[%s5174_s2 + $0x198] sm:$0xff]  ;;  %v2086_v52 = vld [vmem:[%s5174_s2 + $0xb0] sm:$0xff] }
 0x5a9   :  { %v1307_v30 = vpop.f32.mrf.mxu0  ;;  %v3684_v11 = vpop.f32.mrf.mxu1  ;;  %v2091_v42 = vld [vmem:[%s5174_s2 + $0xd8] sm:$0xff] }
 0x5aa   :  { %v1320_v50 = vadd.f32 %v1307_v30, %v1229_v45  ;;  %v1413_v54 = vadd.f32 %v3636_v26, %v1322_v47  ;;  %v2099_v26 = vld [vmem:[%s5174_s2 + $0x118] sm:$0xff]  ;;  %v2097_v30 = vld [vmem:[%s5174_s2 + $0x108] sm:$0xff]  ;;  %v2176_v45 = vld [vmem:[%s5174_s2 + $0x150] sm:$0xff] }
 0x5ab   :  { %v1762_v16 = vpop.f32.mrf.mxu1  ;;  %v2175_v47 = vld [vmem:[%s5174_s2 + $0x148] sm:$0xff] }
 0x5ac   :  { %v1411_v59 = vadd.f32 %v1398_v28, %v1320_v50  ;;  %v2098_v28 = vld [vmem:[%s5174_s2 + $0x110] sm:$0xff]  ;;  %v2087_v50 = vld [vmem:[%s5174_s2 + $0xb8] sm:$0xff] }
 0x5b3   :  { %v3647_v31 = vpop.f32.mrf.mxu0 }
 0x5b4   :  { %v1503_v57 = vadd.f32 %v3647_v31, %v1412_v53  ;;  %v2183_v31 = vld [vmem:[%s5174_s2 + $0x188] sm:$0xff]  ;;  %v2172_v53 = vld [vmem:[%s5174_s2 + $0x130] sm:$0xff] }
 0x5b5   :  { %v1486_v38 = vpop.f32.mrf.mxu0 }
 0x5b6   :  { %v1501_v2 = vadd.f32 %v1486_v38, %v1410_v61  ;;  %v1594_v3 = vadd.f32 %v3659_v29, %v1503_v57  ;;  %v2184_v29 = vld [vmem:[%s5174_s2 + $0x190] sm:$0xff]  ;;  %v2093_v38 = vld [vmem:[%s5174_s2 + $0xe8] sm:$0xff] }
 0x5b7   :  { %v3648_v48 = vpop.f32.mrf.mxu0 }
 0x5b8   :  { %v1504_v58 = vadd.f32 %v3648_v48, %v1413_v54  ;;  %v1592_v13 = vadd.f32 %v1577_v34, %v1501_v2  ;;  %v2095_v34 = vld [vmem:[%s5174_s2 + $0xf8] sm:$0xff]  ;;  %v2088_v48 = vld [vmem:[%s5174_s2 + $0xc0] sm:$0xff]  ;;  %v2085_v54 = vld [vmem:[%s5174_s2 + $0xa8] sm:$0xff] }
 0x5b9   :  { %v1489_v56 = vpop.f32.mrf.mxu0 }
 0x5ba   :  { %v1502_v62 = vadd.f32 %v1489_v56, %v1411_v59  ;;  %v1595_v4 = vadd.f32 %v3660_v43, %v1504_v58  ;;  %v2177_v43 = vld [vmem:[%s5174_s2 + $0x158] sm:$0xff] }
 0x5bc   :  { %v1593_v8 = vadd.f32 %v1580_v51, %v1502_v62  ;;  %v2173_v51 = vld [vmem:[%s5174_s2 + $0x138] sm:$0xff] }
 0x5c3   :  { %v3671_v60 = vpop.f32.mrf.mxu0 }
 0x5c4   :  { %v1685_v9 = vadd.f32 %v3671_v60, %v1594_v3 }
 0x5c5   :  { %v1668_v1 = vpop.f32.mrf.mxu0 }
 0x5c6   :  { %v1776_v15 = vadd.f32 %v3683_v55, %v1685_v9  ;;  %v1683_v6 = vadd.f32 %v1668_v1, %v1592_v13  ;;  %v2171_v55 = vld [vmem:[%s5174_s2 + $0x128] sm:$0xff]  ;;  %v2273_v9 = vld [vmem:[%s5174_s2 + $0x220] sm:$0xff]  ;;  %v2271_v13 = vld [vmem:[%s5174_s2 + $0x210] sm:$0xff] }
 0x5c7   :  { %v3672_v5 = vpop.f32.mrf.mxu0 }
 0x5c8   :  { %v1686_v10 = vadd.f32 %v3672_v5, %v1595_v4  ;;  %v1774_v18 = vadd.f32 %v1759_v63, %v1683_v6  ;;  %v2269_v6 = vld [vmem:[%s5174_s2 + $0x200] sm:$0xff] }
 0x5c9   :  { %v1671_v12 = vpop.f32.mrf.mxu0 }
 0x5ca   :  { %v1777_v14 = vadd.f32 %v3684_v11, %v1686_v10  ;;  %v1684_v7 = vadd.f32 %v1671_v12, %v1593_v8  ;;  %s4027_s13 = spop %4026  ;;  %v2360_v10 = vld [vmem:[%s5174_s2 + $0x2a0] sm:$0xff]  ;;  %v2272_v11 = vld [vmem:[%s5174_s2 + $0x218] sm:$0xff] }
 0x5cb   :  { %v2081_v3 = vstv %s4027_s13  ;;  %v2359_v12 = vld [vmem:[%s5174_s2 + $0x298] sm:$0xff] }
 0x5cc   :  { %3686 = vmatpush3.msra.mxu0 %v1777_v14  ;;  %3697 = vmatpush3.msra.mxu1 %v1777_v14  ;;  %v1775_v17 = vadd.f32 %v1762_v16, %v1684_v7  ;;  %v2270_v7 = vld [vmem:[%s5174_s2 + $0x208] sm:$0xff]  ;;  %v2356_v16 = vld [vmem:[%s5174_s2 + $0x280] sm:$0xff] }
 0x5cd   :  { %3687 = vmatprep.subr.mxu0 %v4130_v0  ;;  %3698 = vmatprep.subr.mxu1 %v4130_v0 }
 0x5ce   :  { %3688 = vmatpush3.msra.mxu0 %v1776_v15  ;;  %3699 = vmatpush3.msra.mxu1 %v1776_v15 }
 0x5cf   :  { %3689 = vmatprep.subr.mxu0 %v4130_v0  ;;  %3700 = vmatprep.subr.mxu1 %v4130_v0 }
 0x5d0   :  { %3690 = vmatpush3.msra.mxu0 %v1775_v17  ;;  %3701 = vmatpush3.msra.mxu1 %v1775_v17 }
 0x5d1   :  { %3691 = vmatprep.subr.mxu0 %v4130_v0  ;;  %3702 = vmatprep.subr.mxu1 %v4130_v0 }
 0x5d2   :  { %3692 = vmatpush3.msra.mxu0 %v1774_v18  ;;  %3703 = vmatpush3.msra.mxu1 %v1774_v18 }
 0x5d3   :  { %3694 = vmatmul.mubr.msk.f32.vlgmr.msra.gmra.mxu0 %vm1779_vm13, %v1778_v19  ;;  %3707 = vmatprep.subr.mxu0 %v4130_v0  ;;  %v2267_v19 = vld [vmem:[%s5174_s2 + $0x1f0] sm:$0xff] }
 0x5d4   :  { %3718 = vmatprep.subr.mxu1 %v4130_v0  ;;  %3705 = vmatmul.mubr.msk.f32.vlgmr.msra.gmra.mxu1 %vm1779_vm13, %v1853_v21  ;;  %v2266_v21 = vld [vmem:[%s5174_s2 + $0x1e8] sm:$0xff] }
 0x5d5   :  { %3708 = vmatpush3.msra.mxu0 %v1777_v14  ;;  %3719 = vmatpush3.msra.mxu1 %v1777_v14  ;;  %v2358_v14 = vld [vmem:[%s5174_s2 + $0x290] sm:$0xff] }
 0x5d6   :  { %3709 = vmatprep.subr.mxu0 %v4130_v0  ;;  %3720 = vmatprep.subr.mxu1 %v4130_v0 }
 0x5d7   :  { %3710 = vmatpush3.msra.mxu0 %v1776_v15  ;;  %3721 = vmatpush3.msra.mxu1 %v1776_v15  ;;  %v2357_v15 = vld [vmem:[%s5174_s2 + $0x288] sm:$0xff] }
 0x5d8   :  { %3711 = vmatprep.subr.mxu0 %v4130_v0  ;;  %3722 = vmatprep.subr.mxu1 %v4130_v0 }
 0x5d9   :  { %3712 = vmatpush3.msra.mxu0 %v1775_v17  ;;  %3723 = vmatpush3.msra.mxu1 %v1775_v17  ;;  %v2268_v17 = vld [vmem:[%s5174_s2 + $0x1f8] sm:$0xff] }
 0x5da   :  { %3713 = vmatprep.subr.mxu0 %v4130_v0  ;;  %3724 = vmatprep.subr.mxu1 %v4130_v0 }
 0x5db   :  { %3714 = vmatpush3.msra.mxu0 %v1774_v18  ;;  %3715 = vmatprep.mubr.msk.f32.mxu0 %vm4131_vm0, %v4130_v0 }
 0x5dc   :  { %3725 = vmatpush3.msra.mxu1 %v1774_v18  ;;  %3726 = vmatprep.mubr.msk.f32.mxu1 %vm4131_vm0, %v4130_v0  ;;  %v2355_v18 = vld [vmem:[%s5174_s2 + $0x278] sm:$0xff] }
 0x5dd   :  { %3716 = vmatmul.mubr.msk.f32.vlgmr.msra.gmra.mxu0 %vm1779_vm13, %v1928_v22  ;;  %3727 = vmatmul.mubr.msk.f32.vlgmr.msra.gmra.mxu1 %vm1779_vm13, %v2003_v23  ;;  %v2353_v22 = vld [vmem:[%s5174_s2 + $0x268] sm:$0xff]  ;;  %v2265_v23 = vld [vmem:[%s5174_s2 + $0x1e0] sm:$0xff] }
 0x5de   :  { %3729 = vmatprep.subr.mxu0 %v4130_v0  ;;  %3764 = vmatprep.subr.mxu1 %v4130_v0 }
 0x5df   :  { %3730 = vmatpush3.msra.mxu0 %v2100_v24  ;;  %3765 = vmatpush3.msra.mxu1 %v2186_v25  ;;  %v2352_v24 = vld [vmem:[%s5174_s2 + $0x260] sm:$0xff]  ;;  %v2264_v25 = vld [vmem:[%s5174_s2 + $0x1d8] sm:$0xff] }
 0x5e0   :  { %3731 = vmatprep.subr.mxu0 %v4130_v0  ;;  %3766 = vmatprep.subr.mxu1 %v4130_v0 }
 0x5e1   :  { %3732 = vmatpush3.msra.mxu0 %v2099_v26  ;;  %3767 = vmatpush3.msra.mxu1 %v2185_v27  ;;  %v2351_v26 = vld [vmem:[%s5174_s2 + $0x258] sm:$0xff]  ;;  %v2263_v27 = vld [vmem:[%s5174_s2 + $0x1d0] sm:$0xff] }
 0x5e2   :  { %3733 = vmatprep.subr.mxu0 %v4130_v0  ;;  %3768 = vmatprep.subr.mxu1 %v4130_v0 }
 0x5e3   :  { %3761 = vmatprep.mubr.msk.f32.mxu0 %vm4131_vm0, %v4130_v0  ;;  %3796 = vmatprep.mubr.msk.f32.mxu1 %vm4131_vm0, %v4130_v0 }
 0x5e4   :  { %3734 = vmatpush3.msra.mxu0 %v2098_v28  ;;  %3769 = vmatpush3.msra.mxu1 %v2184_v29  ;;  %v2350_v28 = vld [vmem:[%s5174_s2 + $0x250] sm:$0xff]  ;;  %v2262_v29 = vld [vmem:[%s5174_s2 + $0x1c8] sm:$0xff] }
 0x5e5   :  { %3735 = vmatprep.subr.mxu0 %v4130_v0  ;;  %3770 = vmatprep.subr.mxu1 %v4130_v0 }
 0x5e6   :  { %3736 = vmatpush3.msra.mxu0 %v2097_v30  ;;  %3771 = vmatpush3.msra.mxu1 %v2183_v31  ;;  %v2349_v30 = vld [vmem:[%s5174_s2 + $0x248] sm:$0xff]  ;;  %v2261_v31 = vld [vmem:[%s5174_s2 + $0x1c0] sm:$0xff] }
 0x5e7   :  { %3737 = vmatprep.subr.mxu0 %v4130_v0  ;;  %3772 = vmatprep.subr.mxu1 %v4130_v0 }
 0x5e8   :  { %3738 = vmatpush3.msra.mxu0 %v2096_v32  ;;  %3773 = vmatpush3.msra.mxu1 %v2182_v33  ;;  %v2348_v32 = vld [vmem:[%s5174_s2 + $0x240] sm:$0xff]  ;;  %v2260_v33 = vld [vmem:[%s5174_s2 + $0x1b8] sm:$0xff] }
 0x5e9   :  { %3739 = vmatprep.subr.mxu0 %v4130_v0  ;;  %3774 = vmatprep.subr.mxu1 %v4130_v0 }
 0x5ea   :  { %3740 = vmatpush3.msra.mxu0 %v2095_v34  ;;  %3775 = vmatpush3.msra.mxu1 %v2181_v35  ;;  %v2347_v34 = vld [vmem:[%s5174_s2 + $0x238] sm:$0xff]  ;;  %v2259_v35 = vld [vmem:[%s5174_s2 + $0x1b0] sm:$0xff] }
 0x5eb   :  { %3741 = vmatprep.subr.mxu0 %v4130_v0  ;;  %3776 = vmatprep.subr.mxu1 %v4130_v0 }
 0x5ec   :  { %3742 = vmatpush3.msra.mxu0 %v2094_v36  ;;  %3777 = vmatpush3.msra.mxu1 %v2180_v37  ;;  %v2346_v36 = vld [vmem:[%s5174_s2 + $0x230] sm:$0xff]  ;;  %v2258_v37 = vld [vmem:[%s5174_s2 + $0x1a8] sm:$0xff] }
 0x5ed   :  { %3743 = vmatprep.subr.mxu0 %v4130_v0  ;;  %3778 = vmatprep.subr.mxu1 %v4130_v0 }
 0x5ee   :  { %3744 = vmatpush3.msra.mxu0 %v2093_v38  ;;  %3779 = vmatpush3.msra.mxu1 %v2179_v39  ;;  %v2345_v38 = vld [vmem:[%s5174_s2 + $0x228] sm:$0xff]  ;;  %v2447_v39 = vld [vmem:[%s5174_s2 + $0x320] sm:$0xff] }
 0x5ef   :  { %3745 = vmatprep.subr.mxu0 %v4130_v0  ;;  %3780 = vmatprep.subr.mxu1 %v4130_v0 }
 0x5f0   :  { %3746 = vmatpush3.msra.mxu0 %v2092_v40  ;;  %3781 = vmatpush3.msra.mxu1 %v2178_v41  ;;  %v2463_v40 = vld [vmem:[%s5174_s2 + $0x3a0] sm:$0xff]  ;;  %v2446_v41 = vld [vmem:[%s5174_s2 + $0x318] sm:$0xff] }
 0x5f1   :  { %3747 = vmatprep.subr.mxu0 %v4130_v0  ;;  %3782 = vmatprep.subr.mxu1 %v4130_v0 }
 0x5f2   :  { %3748 = vmatpush3.msra.mxu0 %v2091_v42  ;;  %3783 = vmatpush3.msra.mxu1 %v2177_v43  ;;  %v2462_v42 = vld [vmem:[%s5174_s2 + $0x398] sm:$0xff]  ;;  %v2445_v43 = vld [vmem:[%s5174_s2 + $0x310] sm:$0xff] }
 0x5f3   :  { %3749 = vmatprep.subr.mxu0 %v4130_v0  ;;  %3784 = vmatprep.subr.mxu1 %v4130_v0 }
 0x5f4   :  { %3750 = vmatpush3.msra.mxu0 %v2090_v44  ;;  %3785 = vmatpush3.msra.mxu1 %v2176_v45  ;;  %v2461_v44 = vld [vmem:[%s5174_s2 + $0x390] sm:$0xff]  ;;  %v2444_v45 = vld [vmem:[%s5174_s2 + $0x308] sm:$0xff] }
 0x5f5   :  { %3751 = vmatprep.subr.mxu0 %v4130_v0  ;;  %3786 = vmatprep.subr.mxu1 %v4130_v0 }
 0x5f6   :  { %3752 = vmatpush3.msra.mxu0 %v2089_v46  ;;  %3787 = vmatpush3.msra.mxu1 %v2175_v47  ;;  %v2460_v46 = vld [vmem:[%s5174_s2 + $0x388] sm:$0xff]  ;;  %v2443_v47 = vld [vmem:[%s5174_s2 + $0x300] sm:$0xff] }
 0x5f7   :  { %3753 = vmatprep.subr.mxu0 %v4130_v0  ;;  %3788 = vmatprep.subr.mxu1 %v4130_v0 }
 0x5f8   :  { %3754 = vmatpush3.msra.mxu0 %v2088_v48  ;;  %3789 = vmatpush3.msra.mxu1 %v2174_v49  ;;  %v2459_v48 = vld [vmem:[%s5174_s2 + $0x380] sm:$0xff]  ;;  %v2442_v49 = vld [vmem:[%s5174_s2 + $0x2f8] sm:$0xff] }
 0x5f9   :  { %3755 = vmatprep.subr.mxu0 %v4130_v0  ;;  %3790 = vmatprep.subr.mxu1 %v4130_v0 }
 0x5fa   :  { %3756 = vmatpush3.msra.mxu0 %v2087_v50  ;;  %3791 = vmatpush3.msra.mxu1 %v2173_v51  ;;  %v2458_v50 = vld [vmem:[%s5174_s2 + $0x378] sm:$0xff]  ;;  %v2441_v51 = vld [vmem:[%s5174_s2 + $0x2f0] sm:$0xff] }
 0x5fb   :  { %3757 = vmatprep.subr.mxu0 %v4130_v0  ;;  %3792 = vmatprep.subr.mxu1 %v4130_v0 }
 0x5fc   :  { %3758 = vmatpush3.msra.mxu0 %v2086_v52  ;;  %3793 = vmatpush3.msra.mxu1 %v2172_v53  ;;  %v2457_v52 = vld [vmem:[%s5174_s2 + $0x370] sm:$0xff]  ;;  %v2440_v53 = vld [vmem:[%s5174_s2 + $0x2e8] sm:$0xff] }
 0x5fd   :  { %3759 = vmatprep.subr.mxu0 %v4130_v0  ;;  %3794 = vmatprep.subr.mxu1 %v4130_v0 }
 0x5fe   :  { %3760 = vmatpush3.msra.mxu0 %v2085_v54  ;;  %3795 = vmatpush3.msra.mxu1 %v2171_v55  ;;  %v2456_v54 = vld [vmem:[%s5174_s2 + $0x368] sm:$0xff]  ;;  %v2439_v55 = vld [vmem:[%s5174_s2 + $0x2e0] sm:$0xff] }
 0x5ff   :  { %3799 = vmatprep.subr.mxu0 %v4130_v0  ;;  %3834 = vmatprep.subr.mxu1 %v4130_v0 }
 0x693   :  { %v1849_v56 = vpop.f32.mrf.mxu0 }
 0x694   :  { %v1923_v57 = vpop.f32.mrf.mxu1 }
 0x695   :  { %v3695_v58 = vpop.f32.mrf.mxu0  ;;  %v1927_v60 = vmax.f32 %v1849_v56, %v1923_v57  ;;  %v2455_v56 = vld [vmem:[%s5174_s2 + $0x360] sm:$0xff]  ;;  %v2438_v57 = vld [vmem:[%s5174_s2 + $0x2d8] sm:$0xff] }
 0x696   :  { %v3706_v59 = vpop.f32.mrf.mxu1  ;;  %v2454_v58 = vld [vmem:[%s5174_s2 + $0x358] sm:$0xff] }
 0x697   :  { %v2437_v59 = vld [vmem:[%s5174_s2 + $0x2d0] sm:$0xff] }
 0x69d   :  { %v1998_v61 = vpop.f32.mrf.mxu0  ;;  %v2073_v62 = vpop.f32.mrf.mxu1 }
 0x69e   :  { %v2002_v63 = vmax.f32 %v1927_v60, %v1998_v61  ;;  %v2453_v60 = vld [vmem:[%s5174_s2 + $0x350] sm:$0xff]  ;;  %v2436_v61 = vld [vmem:[%s5174_s2 + $0x2c8] sm:$0xff] }
 0x69f   :  { %v3717_v1 = vpop.f32.mrf.mxu0  ;;  %v3728_v2 = vpop.f32.mrf.mxu1 }
 0x6a0   :  { %v2077_v4 = vmax.f32 %v2002_v63, %v2073_v62  ;;  %v2452_v62 = vld [vmem:[%s5174_s2 + $0x348] sm:$0xff]  ;;  %v2435_v63 = vld [vmem:[%s5174_s2 + $0x2c0] sm:$0xff]  ;;  %v2434_v2 = vld [vmem:[%s5174_s2 + $0x2b8] sm:$0xff] }
 0x6a1   :  { %v2451_v1 = vld [vmem:[%s5174_s2 + $0x340] sm:$0xff] }
 0x6a2   :  { %v2083_v5 = vadd.f32 %v2081_v3, %v2077_v4  ;;  %v2450_v3 = vld [vmem:[%s5174_s2 + $0x338] sm:$0xff]  ;;  %v2433_v4 = vld [vmem:[%s5174_s2 + $0x2b0] sm:$0xff] }
 0x6a4   :  { %4121 = vtanh.f32 %v2083_v5  ;;  %v2449_v5 = vld [vmem:[%s5174_s2 + $0x330] sm:$0xff] }
 0x6b1   :  { %v4733_v8 = vpop.eup %4121 }
 0x6b2   :  { %3762 = vmatmul.mubr.f32.vlgmr.msra.gmra.mxu0 %v4733_v8  ;;  %3797 = vmatmul.mubr.f32.vlgmr.msra.gmra.mxu1 %v4733_v8 }
 0x6b3   :  { %3800 = vmatpush3.msra.mxu0 %v2273_v9  ;;  %3835 = vmatpush3.msra.mxu1 %v2360_v10  ;;  %v2432_v9 = vld [vmem:[%s5174_s2 + $0x2a8] sm:$0xff] }
 0x6b4   :  { %3801 = vmatprep.subr.mxu0 %v4130_v0  ;;  %3836 = vmatprep.subr.mxu1 %v4130_v0  ;;  %v2448_v10 = vld [vmem:[%s5174_s2 + $0x328] sm:$0xff] }
 0x6b5   :  { %3802 = vmatpush3.msra.mxu0 %v2272_v11  ;;  %3837 = vmatpush3.msra.mxu1 %v2359_v12 }
 0x6b6   :  { %3803 = vmatprep.subr.mxu0 %v4130_v0  ;;  %3838 = vmatprep.subr.mxu1 %v4130_v0 }
 0x6b7   :  { %3804 = vmatpush3.msra.mxu0 %v2271_v13  ;;  %3839 = vmatpush3.msra.mxu1 %v2358_v14 }
 0x6b8   :  { %3805 = vmatprep.subr.mxu0 %v4130_v0  ;;  %3840 = vmatprep.subr.mxu1 %v4130_v0 }
 0x6b9   :  { %3806 = vmatpush3.msra.mxu0 %v2270_v7  ;;  %3841 = vmatpush3.msra.mxu1 %v2357_v15 }
 0x6ba   :  { %3807 = vmatprep.subr.mxu0 %v4130_v0  ;;  %3842 = vmatprep.subr.mxu1 %v4130_v0 }
 0x6bb   :  { %3808 = vmatpush3.msra.mxu0 %v2269_v6  ;;  %3843 = vmatpush3.msra.mxu1 %v2356_v16 }
 0x6bc   :  { %3809 = vmatprep.subr.mxu0 %v4130_v0  ;;  %3844 = vmatprep.subr.mxu1 %v4130_v0 }
 0x6bd   :  { %3810 = vmatpush3.msra.mxu0 %v2268_v17  ;;  %3845 = vmatpush3.msra.mxu1 %v2355_v18 }
 0x6be   :  { %3811 = vmatprep.subr.mxu0 %v4130_v0  ;;  %3846 = vmatprep.subr.mxu1 %v4130_v0 }
 0x6bf   :  { %3812 = vmatpush3.msra.mxu0 %v2267_v19  ;;  %3847 = vmatpush3.msra.mxu1 %v2354_v20  ;;  %v2479_v19 = vld [vmem:[%s5174_s2 + $0x420] sm:$0xff]  ;;  %v2478_v20 = vld [vmem:[%s5174_s2 + $0x418] sm:$0xff] }
 0x6c0   :  { %3813 = vmatprep.subr.mxu0 %v4130_v0  ;;  %3848 = vmatprep.subr.mxu1 %v4130_v0 }
 0x6c1   :  { %3814 = vmatpush3.msra.mxu0 %v2266_v21  ;;  %3849 = vmatpush3.msra.mxu1 %v2353_v22  ;;  %v2477_v21 = vld [vmem:[%s5174_s2 + $0x410] sm:$0xff]  ;;  %v2476_v22 = vld [vmem:[%s5174_s2 + $0x408] sm:$0xff] }
 0x6c2   :  { %3815 = vmatprep.subr.mxu0 %v4130_v0  ;;  %3850 = vmatprep.subr.mxu1 %v4130_v0 }
 0x6c3   :  { %3816 = vmatpush3.msra.mxu0 %v2265_v23  ;;  %3851 = vmatpush3.msra.mxu1 %v2352_v24  ;;  %v2475_v23 = vld [vmem:[%s5174_s2 + $0x400] sm:$0xff]  ;;  %v2474_v24 = vld [vmem:[%s5174_s2 + $0x3f8] sm:$0xff] }
 0x6c4   :  { %3817 = vmatprep.subr.mxu0 %v4130_v0  ;;  %3852 = vmatprep.subr.mxu1 %v4130_v0 }
 0x6c5   :  { %3818 = vmatpush3.msra.mxu0 %v2264_v25  ;;  %3853 = vmatpush3.msra.mxu1 %v2351_v26  ;;  %v2473_v25 = vld [vmem:[%s5174_s2 + $0x3f0] sm:$0xff]  ;;  %v2472_v26 = vld [vmem:[%s5174_s2 + $0x3e8] sm:$0xff] }
 0x6c6   :  { %3819 = vmatprep.subr.mxu0 %v4130_v0  ;;  %3854 = vmatprep.subr.mxu1 %v4130_v0 }
 0x6c7   :  { %3820 = vmatpush3.msra.mxu0 %v2263_v27  ;;  %3855 = vmatpush3.msra.mxu1 %v2350_v28  ;;  %v2471_v27 = vld [vmem:[%s5174_s2 + $0x3e0] sm:$0xff]  ;;  %v2470_v28 = vld [vmem:[%s5174_s2 + $0x3d8] sm:$0xff] }
 0x6c8   :  { %3821 = vmatprep.subr.mxu0 %v4130_v0  ;;  %3856 = vmatprep.subr.mxu1 %v4130_v0 }
 0x6c9   :  { %3822 = vmatpush3.msra.mxu0 %v2262_v29  ;;  %3857 = vmatpush3.msra.mxu1 %v2349_v30  ;;  %v2469_v29 = vld [vmem:[%s5174_s2 + $0x3d0] sm:$0xff]  ;;  %v2468_v30 = vld [vmem:[%s5174_s2 + $0x3c8] sm:$0xff] }
 0x6ca   :  { %3823 = vmatprep.subr.mxu0 %v4130_v0  ;;  %3858 = vmatprep.subr.mxu1 %v4130_v0 }
 0x6cb   :  { %3824 = vmatpush3.msra.mxu0 %v2261_v31  ;;  %3859 = vmatpush3.msra.mxu1 %v2348_v32  ;;  %v2467_v31 = vld [vmem:[%s5174_s2 + $0x3c0] sm:$0xff]  ;;  %v2466_v32 = vld [vmem:[%s5174_s2 + $0x3b8] sm:$0xff] }
 0x6cc   :  { %3825 = vmatprep.subr.mxu0 %v4130_v0  ;;  %3860 = vmatprep.subr.mxu1 %v4130_v0 }
 0x6cd   :  { %3826 = vmatpush3.msra.mxu0 %v2260_v33  ;;  %3861 = vmatpush3.msra.mxu1 %v2347_v34  ;;  %v2465_v33 = vld [vmem:[%s5174_s2 + $0x3b0] sm:$0xff]  ;;  %v2464_v34 = vld [vmem:[%s5174_s2 + $0x3a8] sm:$0xff] }
 0x6ce   :  { %3827 = vmatprep.subr.mxu0 %v4130_v0  ;;  %3862 = vmatprep.subr.mxu1 %v4130_v0 }
 0x6cf   :  { %3828 = vmatpush3.msra.mxu0 %v2259_v35  ;;  %3863 = vmatpush3.msra.mxu1 %v2346_v36  ;;  %v3196_v35 = vld [vmem:[%s5174_s2 + $0x4a9] ss:$0 sm:$0xff] }
 0x6d0   :  { %3829 = vmatprep.subr.mxu0 %v4130_v0  ;;  %3864 = vmatprep.subr.mxu1 %v4130_v0 }
 0x6d1   :  { %3830 = vmatpush3.msra.mxu0 %v2258_v37  ;;  %3831 = vmatprep.mubr.msk.f32.mxu0 %vm4131_vm0, %v4130_v0 }
 0x6d2   :  { %3865 = vmatpush3.msra.mxu1 %v2345_v38  ;;  %3866 = vmatprep.mubr.msk.f32.mxu1 %vm4131_vm0, %v4130_v0  ;;  %v3195_v38 = vld [vmem:[%s5174_s2 + $0x4a8] ss:$0 sm:$0xff] }
 0x6d3   :  { %3832 = vmatmul.mubr.f32.vlgmr.msra.gmra.mxu0 %v4733_v8  ;;  %3867 = vmatmul.mubr.f32.vlgmr.msra.gmra.mxu1 %v4733_v8 }
 0x6d4   :  { %3869 = vmatprep.subr.mxu0 %v4130_v0  ;;  %3904 = vmatprep.subr.mxu1 %v4130_v0 }
 0x6d5   :  { %3901 = vmatprep.mubr.msk.f32.mxu0 %vm4131_vm0, %v4130_v0  ;;  %3936 = vmatprep.mubr.msk.f32.mxu1 %vm4131_vm0, %v4130_v0 }
 0x6d6   :  { %3870 = vmatpush3.msra.mxu0 %v2447_v39  ;;  %3905 = vmatpush3.msra.mxu1 %v2463_v40 }
 0x6d7   :  { %3871 = vmatprep.subr.mxu0 %v4130_v0  ;;  %3906 = vmatprep.subr.mxu1 %v4130_v0 }
 0x6d8   :  { %3872 = vmatpush3.msra.mxu0 %v2446_v41  ;;  %3907 = vmatpush3.msra.mxu1 %v2462_v42 }
 0x6d9   :  { %3873 = vmatprep.subr.mxu0 %v4130_v0  ;;  %3908 = vmatprep.subr.mxu1 %v4130_v0 }
 0x6da   :  { %3874 = vmatpush3.msra.mxu0 %v2445_v43  ;;  %3909 = vmatpush3.msra.mxu1 %v2461_v44  ;;  %v3197_v43 = vld [vmem:[%s5174_s2 + $0x4aa] ss:$0 sm:$0xff] }
 0x6db   :  { %3875 = vmatprep.subr.mxu0 %v4130_v0  ;;  %3910 = vmatprep.subr.mxu1 %v4130_v0 }
 0x6dc   :  { %3876 = vmatpush3.msra.mxu0 %v2444_v45  ;;  %3911 = vmatpush3.msra.mxu1 %v2460_v46 }
 0x6dd   :  { %3877 = vmatprep.subr.mxu0 %v4130_v0  ;;  %3912 = vmatprep.subr.mxu1 %v4130_v0 }
 0x6de   :  { %3878 = vmatpush3.msra.mxu0 %v2443_v47  ;;  %3913 = vmatpush3.msra.mxu1 %v2459_v48  ;;  %v2792_v48 = vld [vmem:[%s5174_s2 + $0x4b0] sm:$0x3f] }
 0x6df   :  { %3879 = vmatprep.subr.mxu0 %v4130_v0  ;;  %3914 = vmatprep.subr.mxu1 %v4130_v0 }
 0x6e0   :  { %3880 = vmatpush3.msra.mxu0 %v2442_v49  ;;  %3915 = vmatpush3.msra.mxu1 %v2458_v50 }
 0x6e1   :  { %3881 = vmatprep.subr.mxu0 %v4130_v0  ;;  %3916 = vmatprep.subr.mxu1 %v4130_v0 }
 0x6e2   :  { %3882 = vmatpush3.msra.mxu0 %v2441_v51  ;;  %3917 = vmatpush3.msra.mxu1 %v2457_v52 }
 0x6e3   :  { %3883 = vmatprep.subr.mxu0 %v4130_v0  ;;  %3918 = vmatprep.subr.mxu1 %v4130_v0 }
 0x6e4   :  { %3884 = vmatpush3.msra.mxu0 %v2440_v53  ;;  %3919 = vmatpush3.msra.mxu1 %v2456_v54 }
 0x6e5   :  { %3885 = vmatprep.subr.mxu0 %v4130_v0  ;;  %3920 = vmatprep.subr.mxu1 %v4130_v0 }
 0x6e6   :  { %3886 = vmatpush3.msra.mxu0 %v2439_v55  ;;  %3921 = vmatpush3.msra.mxu1 %v2455_v56 }
 0x6e7   :  { %3887 = vmatprep.subr.mxu0 %v4130_v0  ;;  %3922 = vmatprep.subr.mxu1 %v4130_v0 }
 0x6e8   :  { %3888 = vmatpush3.msra.mxu0 %v2438_v57  ;;  %3923 = vmatpush3.msra.mxu1 %v2454_v58 }
 0x6e9   :  { %3889 = vmatprep.subr.mxu0 %v4130_v0  ;;  %3924 = vmatprep.subr.mxu1 %v4130_v0 }
 0x6ea   :  { %3890 = vmatpush3.msra.mxu0 %v2437_v59  ;;  %3925 = vmatpush3.msra.mxu1 %v2453_v60 }
 0x6eb   :  { %3891 = vmatprep.subr.mxu0 %v4130_v0  ;;  %3926 = vmatprep.subr.mxu1 %v4130_v0 }
 0x6ec   :  { %3892 = vmatpush3.msra.mxu0 %v2436_v61  ;;  %3927 = vmatpush3.msra.mxu1 %v2452_v62  ;;  %v2495_v61 = vld [vmem:[%s5174_s2 + $0x4a0] sm:$0xff]  ;;  %v2494_v62 = vld [vmem:[%s5174_s2 + $0x498] sm:$0xff] }
 0x6ed   :  { %3893 = vmatprep.subr.mxu0 %v4130_v0  ;;  %3928 = vmatprep.subr.mxu1 %v4130_v0 }
 0x6ee   :  { %3894 = vmatpush3.msra.mxu0 %v2435_v63  ;;  %3929 = vmatpush3.msra.mxu1 %v2451_v1  ;;  %v2493_v63 = vld [vmem:[%s5174_s2 + $0x490] sm:$0xff]  ;;  %v2492_v1 = vld [vmem:[%s5174_s2 + $0x488] sm:$0xff] }
 0x6ef   :  { %3895 = vmatprep.subr.mxu0 %v4130_v0  ;;  %3930 = vmatprep.subr.mxu1 %v4130_v0 }
 0x6f0   :  { %3896 = vmatpush3.msra.mxu0 %v2434_v2  ;;  %3931 = vmatpush3.msra.mxu1 %v2450_v3  ;;  %v2491_v2 = vld [vmem:[%s5174_s2 + $0x480] sm:$0xff]  ;;  %v2490_v3 = vld [vmem:[%s5174_s2 + $0x478] sm:$0xff] }
 0x6f1   :  { %3897 = vmatprep.subr.mxu0 %v4130_v0  ;;  %3932 = vmatprep.subr.mxu1 %v4130_v0 }
 0x6f2   :  { %3898 = vmatpush3.msra.mxu0 %v2433_v4  ;;  %3933 = vmatpush3.msra.mxu1 %v2449_v5  ;;  %v2489_v4 = vld [vmem:[%s5174_s2 + $0x470] sm:$0xff]  ;;  %v2488_v5 = vld [vmem:[%s5174_s2 + $0x468] sm:$0xff] }
 0x6f3   :  { %3899 = vmatprep.subr.mxu0 %v4130_v0  ;;  %3934 = vmatprep.subr.mxu1 %v4130_v0 }
 0x6f4   :  { %3900 = vmatpush3.msra.mxu0 %v2432_v9  ;;  %3935 = vmatpush3.msra.mxu1 %v2448_v10  ;;  %v2487_v9 = vld [vmem:[%s5174_s2 + $0x460] sm:$0xff]  ;;  %v2486_v10 = vld [vmem:[%s5174_s2 + $0x458] sm:$0xff] }
 0x6f5   :  { %3939 = vmatprep.subr.mxu0 %v4130_v0  ;;  %3979 = vmatprep.subr.mxu1 %v4130_v0 }
 0x772   :  { %v2167_v8 = vpop.f32.mrf.mxu0  ;;  %v2253_v11 = vpop.f32.mrf.mxu1 }
 0x773   :  { %v2257_v14 = vmax.f32 %v2167_v8, %v2253_v11  ;;  %v2485_v8 = vld [vmem:[%s5174_s2 + $0x450] sm:$0xff]  ;;  %v2484_v11 = vld [vmem:[%s5174_s2 + $0x448] sm:$0xff] }
 0x774   :  { %v3763_v12 = vpop.f32.mrf.mxu0  ;;  %v3798_v13 = vpop.f32.mrf.mxu1 }
 0x775   :  { %v2483_v12 = vld [vmem:[%s5174_s2 + $0x440] sm:$0xff]  ;;  %v2482_v13 = vld [vmem:[%s5174_s2 + $0x438] sm:$0xff] }
 0x793   :  { %v2340_v7 = vpop.f32.mrf.mxu0  ;;  %v2427_v15 = vpop.f32.mrf.mxu1 }
 0x794   :  { %v2344_v6 = vmax.f32 %v2257_v14, %v2340_v7  ;;  %v2481_v14 = vld [vmem:[%s5174_s2 + $0x430] sm:$0xff]  ;;  %v2480_v7 = vld [vmem:[%s5174_s2 + $0x428] sm:$0xff] }
 0x795   :  { %v3833_v16 = vpop.f32.mrf.mxu0  ;;  %v3868_v17 = vpop.f32.mrf.mxu1 }
 0x796   :  { %v2431_v18 = vmax.f32 %v2344_v6, %v2427_v15  ;;  %v3200_v16 = vld [vmem:[%s5174_s2 + $0x4ab] ss:$0 sm:$0xff] }
 0x798   :  { %3902 = vmatmul.mubr.f32.vlgmr.msra.gmra.mxu0 %v2431_v18  ;;  %3937 = vmatmul.mubr.f32.vlgmr.msra.gmra.mxu1 %v2431_v18 }
 0x799   :  { %3940 = vmatpush3.msra.mxu0 %v2479_v19  ;;  %3971 = vmatprep.mubr.msk.f32.mxu0 %vm4131_vm0, %v4130_v0 }
 0x79a   :  { %3941 = vmatprep.subr.mxu0 %v4130_v0  ;;  %3981 = vmatprep.mubr.msk.f32.mxu1 %vm4131_vm0, %v4130_v0 }
 0x79b   :  { %3942 = vmatpush3.msra.mxu0 %v2478_v20 }
 0x79c   :  { %3943 = vmatprep.subr.mxu0 %v4130_v0 }
 0x79d   :  { %3944 = vmatpush3.msra.mxu0 %v2477_v21  ;;  %v2960_v21 = vld [vmem:[%s5174_s2 + $0x4c0] sm:$0x3] }
 0x79e   :  { %3945 = vmatprep.subr.mxu0 %v4130_v0 }
 0x79f   :  { %3946 = vmatpush3.msra.mxu0 %v2476_v22 }
 0x7a0   :  { %3947 = vmatprep.subr.mxu0 %v4130_v0 }
 0x7a1   :  { %3948 = vmatpush3.msra.mxu0 %v2475_v23 }
 0x7a2   :  { %3949 = vmatprep.subr.mxu0 %v4130_v0 }
 0x7a3   :  { %3950 = vmatpush3.msra.mxu0 %v2474_v24 }
 0x7a4   :  { %3951 = vmatprep.subr.mxu0 %v4130_v0 }
 0x7a5   :  { %3952 = vmatpush3.msra.mxu0 %v2473_v25  ;;  %v4129_v25 = vld [vmem:[%s5174_s2] ss:$0 sm:$0xff] }
 0x7a6   :  { %3953 = vmatprep.subr.mxu0 %v4130_v0 }
 0x7a7   :  { %3954 = vmatpush3.msra.mxu0 %v2472_v26 }
 0x7a8   :  { %3955 = vmatprep.subr.mxu0 %v4130_v0 }
 0x7a9   :  { %3956 = vmatpush3.msra.mxu0 %v2471_v27 }
 0x7aa   :  { %3957 = vmatprep.subr.mxu0 %v4130_v0 }
 0x7ab   :  { %3958 = vmatpush3.msra.mxu0 %v2470_v28 }
 0x7ac   :  { %3959 = vmatprep.subr.mxu0 %v4130_v0 }
 0x7ad   :  { %3960 = vmatpush3.msra.mxu0 %v2469_v29 }
 0x7ae   :  { %3961 = vmatprep.subr.mxu0 %v4130_v0 }
 0x7af   :  { %3962 = vmatpush3.msra.mxu0 %v2468_v30 }
 0x7b0   :  { %3963 = vmatprep.subr.mxu0 %v4130_v0 }
 0x7b1   :  { %3964 = vmatpush3.msra.mxu0 %v2467_v31 }
 0x7b2   :  { %3965 = vmatprep.subr.mxu0 %v4130_v0 }
 0x7b3   :  { %3966 = vmatpush3.msra.mxu0 %v2466_v32 }
 0x7b4   :  { %3967 = vmatprep.subr.mxu0 %v4130_v0 }
 0x7b5   :  { %3968 = vmatpush3.msra.mxu0 %v2465_v33 }
 0x7b6   :  { %3969 = vmatprep.subr.mxu0 %v4130_v0 }
 0x7b7   :  { %3970 = vmatpush3.msra.mxu0 %v2464_v34 }
 0x7b8   :  { %3972 = vmatmul.mubr.f32.vlgmr.msra.gmra.mxu0 %v2431_v18  ;;  %3974 = vmatprep.subr.mxu0 %v4130_v0  ;;  %v2959_v18 = vld [vmem:[%s5174_s2 + $0x4b8] sm:$0x3f] }
 0x7b9   :  { %3976 = vmatprep.mubr.msk.f32.mxu0 %vm4131_vm0, %v4130_v0 }
 0x858   :  { %v2570_v36 = vpop.f32.mrf.mxu0  ;;  %v2644_v37 = vpop.f32.mrf.mxu1 }
 0x859   :  { %v2645_v39 = vadd.f32 %v3196_v35, %v2644_v37  ;;  %v2571_v42 = vadd.f32 %v3195_v38, %v2570_v36 }
 0x85a   :  { %v3903_v40 = vpop.f32.mrf.mxu0  ;;  %v3938_v41 = vpop.f32.mrf.mxu1 }
 0x85b   :  { %3975 = vmatpush3.xpose.msra.mxu0 %v2645_v39 }
 0x85c   :  { %4019 = vmatprep.subr.mxu0 %v4130_v0 }
 0x85e   :  { %3977 = vmatmul.mubr.f32.vlgmr.msra.gmra.mxu0 %v2571_v42 }
 0x85f   :  { %4021 = vmatprep.mubr.msk.f32.mxu0 %vm4131_vm0, %v4130_v0 }
 0x878   :  { %v2718_v44 = vpop.f32.mrf.mxu0 }
 0x879   :  { %v2719_v45 = vadd.f32 %v3197_v43, %v2718_v44 }
 0x87a   :  { %v3973_v46 = vpop.f32.mrf.mxu0 }
 0x87b   :  { %3980 = vmatpush3.msk.msra.mxu1 %vm2811_vm14, %v2719_v45 }
 0x87c   :  { %3984 = vmatprep.subr.mxu1 %v4130_v0 }
 0x91e   :  { %v2788_v47 = vpop.f32.mrf.mxu0 }
 0x91f   :  { %v2793_v49 = vmul.f32 0.31622776, %v2788_v47 }
 0x920   :  { %v3978_v50 = vpop.f32.mrf.mxu0 }
 0x921   :  { %v2794_v51 = vadd.f32 %v2793_v49, %v2792_v48 }
 0x923   :  { %v2796_v52 = vsel %vm2795_vm15, %v2794_v51, -inf }
 0x924   :  { %2797 = vmax.xlane.f32.xlu1 %v2796_v52 }
 0x9ad   :  { %v2798_v53 = vpop.xlane.xlu1 %2797 }
 0x9ae   :  { %v2799_v54 = vsub.f32 %v2794_v51, %v2798_v53 }
 0x9b0   :  { %v2800_v55 = vmul.f32 1.442695, %v2799_v54 }
 0x9b2   :  { %4123 = vpow2.f32 %v2800_v55 }
 0x9bf   :  { %v4124_v56 = vpop.eup %4123 }
 0x9c0   :  { %v2802_v57 = vsel %vm2795_vm15, %v4124_v56, 0.0 }
 0x9c1   :  { %2803 = vadd.xlane.f32.xlu0 %v2802_v57 }
 0xa4a   :  { %v2804_v58 = vpop.xlane.xlu0 %2803 }
 0xa4b   :  { %4125 = vrcp.f32 %v2804_v58 }
 0xa58   :  { %v4126_v59 = vpop.eup %4125 }
 0xa59   :  { %v2806_v60 = vmul.f32 %v4126_v59, %v4124_v56 }
 0xa5b   :  { %3982 = vmatmul.mubr.msk.f32.vlgmr.msra.gmra.mxu1 %vm2807_vm1, %v2806_v60  ;;  %3047 = vst.msk [vmem:[%s5176_s3] sm:$0x3f] %vm2795_vm15, %v2806_v60 }
 0xa5c   :  { %3985 = vmatpush3.msra.mxu1 %v2495_v61  ;;  %4016 = vmatprep.mubr.msk.f32.mxu1 %vm4131_vm0, %v4130_v0  ;;  %vm3038_vm0 = vcmask 1041408  }
 0xa5d   :  { %3986 = vmatprep.subr.mxu1 %v4130_v0 }
 0xa5e   :  { %3987 = vmatpush3.msra.mxu1 %v2494_v62 }
 0xa5f   :  { %3988 = vmatprep.subr.mxu1 %v4130_v0 }
 0xa60   :  { %3989 = vmatpush3.msra.mxu1 %v2493_v63 }
 0xa61   :  { %3990 = vmatprep.subr.mxu1 %v4130_v0 }
 0xa62   :  { %3991 = vmatpush3.msra.mxu1 %v2492_v1 }
 0xa63   :  { %3992 = vmatprep.subr.mxu1 %v4130_v0 }
 0xa64   :  { %3993 = vmatpush3.msra.mxu1 %v2491_v2 }
 0xa65   :  { %3994 = vmatprep.subr.mxu1 %v4130_v0 }
 0xa66   :  { %3995 = vmatpush3.msra.mxu1 %v2490_v3 }
 0xa67   :  { %3996 = vmatprep.subr.mxu1 %v4130_v0 }
 0xa68   :  { %3997 = vmatpush3.msra.mxu1 %v2489_v4 }
 0xa69   :  { %3998 = vmatprep.subr.mxu1 %v4130_v0 }
 0xa6a   :  { %3999 = vmatpush3.msra.mxu1 %v2488_v5 }
 0xa6b   :  { %4000 = vmatprep.subr.mxu1 %v4130_v0 }
 0xa6c   :  { %4001 = vmatpush3.msra.mxu1 %v2487_v9 }
 0xa6d   :  { %4002 = vmatprep.subr.mxu1 %v4130_v0 }
 0xa6e   :  { %4003 = vmatpush3.msra.mxu1 %v2486_v10 }
 0xa6f   :  { %4004 = vmatprep.subr.mxu1 %v4130_v0 }
 0xa70   :  { %4005 = vmatpush3.msra.mxu1 %v2485_v8 }
 0xa71   :  { %4006 = vmatprep.subr.mxu1 %v4130_v0 }
 0xa72   :  { %4007 = vmatpush3.msra.mxu1 %v2484_v11 }
 0xa73   :  { %4008 = vmatprep.subr.mxu1 %v4130_v0 }
 0xa74   :  { %4009 = vmatpush3.msra.mxu1 %v2483_v12 }
 0xa75   :  { %4010 = vmatprep.subr.mxu1 %v4130_v0 }
 0xa76   :  { %4011 = vmatpush3.msra.mxu1 %v2482_v13 }
 0xa77   :  { %4012 = vmatprep.subr.mxu1 %v4130_v0 }
 0xa78   :  { %4013 = vmatpush3.msra.mxu1 %v2481_v14 }
 0xa79   :  { %4014 = vmatprep.subr.mxu1 %v4130_v0 }
 0xa7a   :  { %4015 = vmatpush3.msra.mxu1 %v2480_v7 }
 0xb1b   :  { %v2881_v15 = vpop.f32.mrf.mxu1 }
 0xb1c   :  { %4017 = vmatmul.mubr.f32.vlgmr.msra.gmra.mxu1 %v2881_v15 }
 0xb1d   :  { %v3983_v6 = vpop.f32.mrf.mxu1 }
 0xbdc   :  { %v2955_v17 = vpop.f32.mrf.mxu1 }
 0xbdd   :  { %v2956_v19 = vadd.f32 %v3200_v16, %v2955_v17 }
 0xbde   :  { %v4018_v20 = vpop.f32.mrf.mxu1 }
 0xbdf   :  { %v2961_v0 = vmul.f32 %v2959_v18, %v2956_v19 }
 0xbe1   :  { %4020 = vmatpush3.msk.msra.mxu0 %vm2811_vm14, %v2961_v0 }
 0xbe2   :  { %4022 = vmatmul.mubr.msk.f32.vlgmr.msra.gmra.mxu0 %vm2807_vm1, %v2960_v21 }
 0xca2   :  { %v3034_v22 = vpop.f32.mrf.mxu0 }
 0xca3   :  { %v3039_v23 = vsel %vm3038_vm0, %v3034_v22, 0.0 }
 0xca4   :  { %v4023_v24 = vpop.f32.mrf.mxu0  ;;  %3040 = vadd.xlane.f32.xlu1 %v3039_v23 }
 0xd2d   :  { %v3041_v26 = vpop.xlane.xlu1 %3040 }
 0xd2e   :  { %v3046_v27 = vadd.f32 %v4129_v25, %v3041_v26 }
 0xd30   :  { %3056 = vrot.lane.b32.xlu0 %v3046_v27, %s4134_s21 }
 0xda2   :  { %v3057_v28 = vpop.permute.xlu0 %3056 }
 0xda3   :  { %3060 = vst.msk [vmem:[%s5176_s3 + $0x38] sm:$0x3] %vm3059_vm2, %v3057_v28 }

</bundles_post_ra>
